<compile_context>
chip_gen: v5e
topology: v5e:2x2
jax: 0.10.0
libtpu: 0.0.40
codegen_flags: <defaults>
</compile_context>

<pallas_src>
import functools

import numpy as np
import jax
import jax.numpy as jnp
from jax.experimental import pallas as pl
from jax.experimental.pallas import tpu as pltpu

EPS = 1e-5


# --------------------------------- sizing helpers -----------------------------------
def _vmem_budget_bytes():
    """Per-generation scoped-VMEM budget: ~half of physical VMEM, capped."""
    cap = 128 * 1024 * 1024
    try:
        info = pltpu.get_tpu_info()
        cap = int(getattr(info, "vmem_capacity_bytes", cap))
    except Exception:
        pass
    return int(min(cap // 2, 96 * 1024 * 1024))


def _pick_bt(batch, per_image_bytes, budget):
    """Largest divisor of `batch` whose per-step footprint fits ~1/4 of the scoped
    budget (double-buffered in+out), preferring >= 2 grid steps (v7x megacore)."""
    cap = max(1, budget // (4 * max(per_image_bytes, 1)))
    divs = [d for d in range(1, batch + 1) if batch % d == 0 and d <= cap]
    bt = max(divs) if divs else 1
    if batch // bt < 2:
        smaller = [d for d in divs if batch // d >= 2]
        if smaller:
            bt = max(smaller)
    return bt


# -------------------- pass 1: im2col conv + per-block BN partial sums ---------------
def conv_stats_kernel(xp_ref, w_ref, cb_ref, y_ref, psum_ref, psq_ref, *, kh, kw):
    # xp_ref  : (Bt, Cin, Hp, Wp)   zero-padded channel-major images (real channels)
    # w_ref   : (Cout, kh*kw*Cin)   conv weight, matmul-ready
    # cb_ref  : (Cout, H*W)         precomputed coord-channel bias plane (f32)
    # y_ref   : (Bt, Cout, H*W)     conv output, pixels on the lane axis
    # psum_ref/psq_ref: (1, Cout, 1) per-block BN channel sum / sum of squares (f32)
    bt, cin, hp, wp = xp_ref.shape
    cout = w_ref.shape[0]
    h = hp - (kh - 1)
    w = wp - (kw - 1)
    hw = h * w

    w_flat = w_ref[...]                          # resident (Cout, kh*kw*Cin)
    cbias = cb_ref[...]                          # (Cout, H*W) f32

    psum = jnp.zeros((cout, 1), jnp.float32)     # register accumulators
    psq = jnp.zeros((cout, 1), jnp.float32)
    for bi in range(bt):                         # static unroll over images in block
        ximg = xp_ref[bi]                        # (Cin, Hp, Wp)
        # im2col: fold the taps into the contraction dim -> one lane-dense MXU matmul.
        taps = [ximg[:, ky:ky + h, kx:kx + w].reshape(cin, hw)
                for ky in range(kh) for kx in range(kw)]
        patch = jnp.concatenate(taps, axis=0)    # (kh*kw*Cin, H*W)
        y = jnp.dot(w_flat, patch, preferred_element_type=jnp.float32) + cbias
        y_ref[bi] = y.astype(y_ref.dtype)        # (Cout, H*W) lane-dense store
        psum = psum + jnp.sum(y, axis=1, keepdims=True)      # stats from f32 result
        psq = psq + jnp.sum(y * y, axis=1, keepdims=True)
    psum_ref[0] = psum
    psq_ref[0] = psq


# --------------------- pass 2: streaming BN affine apply + ReLU ---------------------
def bn_relu_kernel(y_ref, scale_ref, shift_ref, o_ref):
    # y_ref: (Bt, Cout, H*W)   scale/shift: (Cout, 1)   o_ref: (Bt, Cout, H*W) f32
    y = y_ref[...].astype(jnp.float32)
    o_ref[...] = jnp.maximum(y * scale_ref[...][None] + shift_ref[...][None], 0.0)


# ------------------------------------ wrapper ---------------------------------------
@functools.partial(jax.jit,
                   static_argnames=("padding", "matmul_dtype", "intermediate_dtype"))
def coord_conv(x_nchw, weight_hwio, gamma, beta, padding=1,
               matmul_dtype=jnp.bfloat16, intermediate_dtype=jnp.bfloat16):
    """CoordConv forward. x_nchw: (B, Cin, H, W) -> (B, Cout, H, W) float32."""
    B, Cin, H, W = x_nchw.shape
    KH, KW, Cw, Cout = weight_hwio.shape
    assert Cw == Cin + 2
    assert KH - 1 == 2 * padding and KW - 1 == 2 * padding   # 'same' conv
    Hp, Wp = H + 2 * padding, W + 2 * padding
    HW = H * W

    # Channel-major zero-padded input (no NHWC transpose), matmul-dtype cast.
    xp = jnp.pad(x_nchw, ((0, 0), (0, 0), (padding, padding),
                          (padding, padding))).astype(matmul_dtype)
    # Weight pre-flattened to (Cout, KH*KW*Cin); row order matches the in-kernel
    # im2col ((ky, kx) outer, Cin inner).
    w_flat = jnp.transpose(weight_hwio[:, :, :Cin, :], (3, 0, 1, 2)
                           ).reshape(Cout, KH * KW * Cin).astype(matmul_dtype)

    # Coord channels are batch independent; by linearity of conv their contribution
    # is a fixed (Cout, H*W) bias plane, precomputed once in f32.
    xr = jnp.linspace(-1.0, 1.0, W, dtype=jnp.float32)
    yr = jnp.linspace(-1.0, 1.0, H, dtype=jnp.float32)
    yy, xx = jnp.meshgrid(yr, xr, indexing="ij")              # (H, W) each
    cpad = jnp.pad(jnp.stack([xx, yy], axis=-1),
                   ((padding, padding), (padding, padding), (0, 0)))   # (Hp, Wp, 2)
    w_c = weight_hwio[:, :, Cin:, :].astype(jnp.float32)      # (KH, KW, 2, Cout)
    cb = jnp.zeros((H, W, Cout), jnp.float32)
    for ky in range(KH):
        for kx in range(KW):
            cb = cb + jnp.tensordot(cpad[ky:ky + H, kx:kx + W, :], w_c[ky, kx],
                                    axes=([2], [0]),
                                    precision=jax.lax.Precision.HIGHEST)
    coord_bias = jnp.transpose(cb, (2, 0, 1)).reshape(Cout, HW)

    # Batch blocking sized against per-generation VMEM (v7x: 64 MiB/TC vs 128 MiB).
    budget = _vmem_budget_bytes()
    in_sz = np.dtype(matmul_dtype).itemsize
    mid_sz = np.dtype(intermediate_dtype).itemsize
    per_img = Cin * Hp * Wp * in_sz + Cout * HW * (mid_sz + 4) + 2 * Cout * 4
    bt = _pick_bt(B, per_img, budget)
    nb = B // bt

    cparams = pltpu.CompilerParams(dimension_semantics=("parallel",),
                                   vmem_limit_bytes=budget)
    cost1 = pl.CostEstimate(
        flops=int(2 * B * HW * Cout * (KH * KW * Cin + 1)),
        transcendentals=0,
        bytes_accessed=int(B * Cin * Hp * Wp * in_sz + Cout * KH * KW * Cin * in_sz
                           + Cout * HW * 4 + B * Cout * HW * mid_sz
                           + 2 * nb * Cout * 4))

    # ---- pass 1: conv (+ coord bias) and per-block BN partial sums ------------------
    conv_flat, psum, psq = pl.pallas_call(
        functools.partial(conv_stats_kernel, kh=KH, kw=KW),
        out_shape=(
            jax.ShapeDtypeStruct((B, Cout, HW), intermediate_dtype),
            jax.ShapeDtypeStruct((nb, Cout, 1), jnp.float32),
            jax.ShapeDtypeStruct((nb, Cout, 1), jnp.float32),
        ),
        grid=(nb,),
        in_specs=[
            pl.BlockSpec((bt, Cin, Hp, Wp), lambda b: (b, 0, 0, 0)),
            pl.BlockSpec((Cout, KH * KW * Cin), lambda b: (0, 0)),
            pl.BlockSpec((Cout, HW), lambda b: (0, 0)),
        ],
        out_specs=(
            pl.BlockSpec((bt, Cout, HW), lambda b: (b, 0, 0)),
            pl.BlockSpec((1, Cout, 1), lambda b: (b, 0, 0)),
            pl.BlockSpec((1, Cout, 1), lambda b: (b, 0, 0)),
        ),
        compiler_params=cparams,
        cost_estimate=cost1,
    )(xp, w_flat, coord_bias)

    # ---- BN finalize hoisted out of the kernels: tiny (nb, Cout, 1) reductions ------
    count = float(B * HW)
    s = jnp.sum(psum, axis=0)                        # (Cout, 1)
    sq = jnp.sum(psq, axis=0)
    mean = s / count
    var = jnp.maximum(sq / count - mean * mean, 0.0)  # biased var (BN training mode)
    # TODO(synk): E[x^2]-E[x]^2 can cancel for large-mean activations; switch to a
    # Welford-style combine of per-block (count, mean, M2) if that regime matters.
    scale = gamma.reshape(Cout, 1).astype(jnp.float32) * jax.lax.rsqrt(var + EPS)
    shift = beta.reshape(Cout, 1).astype(jnp.float32) - mean * scale

    # ---- pass 2: streaming y*scale+shift, ReLU (lane-dense), f32 output -------------
    io_alias = {0: 0} if np.dtype(intermediate_dtype) == np.dtype(np.float32) else {}
    out_flat = pl.pallas_call(
        bn_relu_kernel,
        out_shape=jax.ShapeDtypeStruct((B, Cout, HW), jnp.float32),
        grid=(nb,),
        in_specs=[
            pl.BlockSpec((bt, Cout, HW), lambda b: (b, 0, 0)),
            pl.BlockSpec((Cout, 1), lambda b: (0, 0)),
            pl.BlockSpec((Cout, 1), lambda b: (0, 0)),
        ],
        out_specs=pl.BlockSpec((bt, Cout, HW), lambda b: (b, 0, 0)),
        input_output_aliases=io_alias,
        compiler_params=cparams,
    )(conv_flat, scale, shift)

    # (B, Cout, H*W) -> NCHW is a free row-major reshape (no transpose HBM pass).
    return out_flat.reshape(B, Cout, H, W)


# ----------------------------------- references -------------------------------------
def add_coord_nchw(x):
    """Replicates CoordConv.add_coord (PyTorch) in NCHW."""
    B, _, H, W = x.shape
    xr = jnp.linspace(-1.0, 1.0, W, dtype=x.dtype)
    yr = jnp.linspace(-1.0, 1.0, H, dtype=x.dtype)
    yy, xx = jnp.meshgrid(yr, xr, indexing="ij")
    xc = jnp.broadcast_to(xx[None, None], (B, 1, H, W))
    yc = jnp.broadcast_to(yy[None, None], (B, 1, H, W))
    return jnp.concatenate([x, xc, yc], axis=1)


def reference(x_nchw, weight_hwio, gamma, beta, padding=1,
              matmul_dtype=jnp.float32, intermediate_dtype=jnp.float32):
    """Plain-JAX reference (PyTorch forward, training-mode BN).  `matmul_dtype`
    quantizes exactly what the kernel's MXU path quantizes (real input channels and
    their weights; coords / BN epilogue stay f32); `intermediate_dtype` models the
    conv-output storage dtype between the two passes (stats stay f32)."""
    B, Cin, H, W = x_nchw.shape
    xq = x_nchw.astype(matmul_dtype).astype(jnp.float32)
    wq = jnp.concatenate(
        [weight_hwio[:, :, :Cin, :].astype(matmul_dtype).astype(jnp.float32),
         weight_hwio[:, :, Cin:, :].astype(jnp.float32)], axis=2)
    x_aug = add_coord_nchw(xq)
    x_nhwc = jnp.transpose(x_aug, (0, 2, 3, 1))
    y = jax.lax.conv_general_dilated(
        x_nhwc, wq, window_strides=(1, 1),
        padding=((padding, padding), (padding, padding)),
        dimension_numbers=("NHWC", "HWIO", "NHWC"),
        precision=jax.lax.Precision.HIGHEST)
    mean = jnp.mean(y, axis=(0, 1, 2))
    var = jnp.var(y, axis=(0, 1, 2))                          # biased, as BN uses
    scale = gamma * jax.lax.rsqrt(var + EPS)
    shift = beta - mean * scale
    y_store = y.astype(intermediate_dtype).astype(jnp.float32)
    out = jnp.maximum(y_store * scale + shift, 0.0)
    return jnp.transpose(out, (0, 3, 1, 2))


if __name__ == "__main__":
    key = jax.random.PRNGKey(0)
    B, Cin, H, W = 2, 4, 16, 16
    Cout, K, PAD = 8, 3, 1

    k_x, k_w = jax.random.split(key)
    x = jax.random.normal(k_x, (B, Cin, H, W), dtype=jnp.float32)

    # nn.Conv2d(Cin+2, Cout, 3, 1, 1, bias=False) shaped weight, kaiming-uniform-ish.
    fan_in = (Cin + 2) * K * K
    bound = 1.0 / (fan_in ** 0.5)
    weight_hwio = jax.random.uniform(
        k_w, (K, K, Cin + 2, Cout), dtype=jnp.float32, minval=-bound, maxval=bound)
    gamma = jnp.ones((Cout,), jnp.float32)    # BatchNorm2d default weight
    beta = jnp.zeros((Cout,), jnp.float32)    # BatchNorm2d default bias

    # (A) f32 MXU path, f32 intermediate vs. f32 reference.
    out = jax.block_until_ready(coord_conv(
        x, weight_hwio, gamma, beta, padding=PAD,
        matmul_dtype=jnp.float32, intermediate_dtype=jnp.float32))
    ref = jax.block_until_ready(reference(x, weight_hwio, gamma, beta, padding=PAD))
    assert out.shape == (B, Cout, H, W), out.shape
    err = float(jnp.max(jnp.abs(out - ref)))
    assert err < 2e-2, err

    # (B) bf16 MXU inputs, f32 intermediate vs. an identically quantized reference
    # (bf16 products are exact in f32, so this is a tight logic check).
    out_b = jax.block_until_ready(coord_conv(
        x, weight_hwio, gamma, beta, padding=PAD,
        matmul_dtype=jnp.bfloat16, intermediate_dtype=jnp.float32))
    ref_b = jax.block_until_ready(reference(
        x, weight_hwio, gamma, beta, padding=PAD,
        matmul_dtype=jnp.bfloat16, intermediate_dtype=jnp.float32))
    err_b = float(jnp.max(jnp.abs(out_b - ref_b)))
    assert err_b < 2e-3, err_b

    # (C) fully bandwidth-optimized default path: bf16 MXU + bf16 intermediate.
    out_c = jax.block_until_ready(coord_conv(x, weight_hwio, gamma, beta, padding=PAD))
    ref_c = jax.block_until_ready(reference(
        x, weight_hwio, gamma, beta, padding=PAD,
        matmul_dtype=jnp.bfloat16, intermediate_dtype=jnp.bfloat16))
    err_c = float(jnp.max(jnp.abs(out_c - ref_c)))
    assert err_c < 2e-2, err_c

    print("KERNEL_OK")
</pallas_src>

<mosaic_0001>
module attributes {stable_mosaic.version = 11 : i64} {
  func.func @conv_stats_kernel(%arg0: i32, %arg1: memref<1x4x18x18xf32, #tpu.memory_space<vmem>>, %arg2: memref<8x36xf32, #tpu.memory_space<vmem>>, %arg3: memref<8x256xf32, #tpu.memory_space<vmem>>, %arg4: memref<1x8x256xf32, #tpu.memory_space<vmem>>, %arg5: memref<1x8x1xf32, #tpu.memory_space<vmem>>, %arg6: memref<1x8x1xf32, #tpu.memory_space<vmem>>) attributes {dimension_semantics = [#tpu.dimension_semantics<parallel>], iteration_bounds = array<i64: 2>, scalar_prefetch = 0 : i64, scratch_operands = 0 : i64, tpu.core_type = #tpu.core_type<tc>, window_params = [{transform_indices = @transform_0, window_bounds = array<i64: 1, 4, 18, 18>}, {pipeline_mode = #tpu.pipeline_mode<synchronous>, transform_indices = @transform_1, window_bounds = array<i64: 8, 36>}, {pipeline_mode = #tpu.pipeline_mode<synchronous>, transform_indices = @transform_2, window_bounds = array<i64: 8, 256>}, {transform_indices = @transform_3, window_bounds = array<i64: 1, 8, 256>}, {transform_indices = @transform_4, window_bounds = array<i64: 1, 8, 1>}, {transform_indices = @transform_5, window_bounds = array<i64: 1, 8, 1>}]} {
    %c0 = arith.constant 0 : index
    %c0_0 = arith.constant 0 : index
    %0 = vector.load %arg2[%c0, %c0_0] : memref<8x36xf32, #tpu.memory_space<vmem>>, vector<8x36xf32>
    %c0_1 = arith.constant 0 : index
    %c0_2 = arith.constant 0 : index
    %1 = vector.load %arg3[%c0_1, %c0_2] : memref<8x256xf32, #tpu.memory_space<vmem>>, vector<8x256xf32>
    %cst = arith.constant 0.000000e+00 : f32
    %2 = vector.broadcast %cst : f32 to vector<8x1xf32>
    %cst_3 = arith.constant 0.000000e+00 : f32
    %3 = vector.broadcast %cst_3 : f32 to vector<8x1xf32>
    %c0_4 = arith.constant 0 : index
    %c0_5 = arith.constant 0 : index
    %c0_6 = arith.constant 0 : index
    %c0_7 = arith.constant 0 : index
    %4 = vector.load %arg1[%c0_4, %c0_5, %c0_6, %c0_7] : memref<1x4x18x18xf32, #tpu.memory_space<vmem>>, vector<1x4x18x18xf32>
    %5 = vector.shape_cast %4 : vector<1x4x18x18xf32> to vector<4x18x18xf32>
    %6 = vector.extract_strided_slice %5 {offsets = [0, 0, 0], sizes = [4, 16, 16], strides = [1, 1, 1]} : vector<4x18x18xf32> to vector<4x16x16xf32>
    %7 = vector.shape_cast %6 : vector<4x16x16xf32> to vector<4x256xf32>
    %8 = vector.extract_strided_slice %5 {offsets = [0, 0, 1], sizes = [4, 16, 16], strides = [1, 1, 1]} : vector<4x18x18xf32> to vector<4x16x16xf32>
    %9 = vector.shape_cast %8 : vector<4x16x16xf32> to vector<4x256xf32>
    %10 = vector.extract_strided_slice %5 {offsets = [0, 0, 2], sizes = [4, 16, 16], strides = [1, 1, 1]} : vector<4x18x18xf32> to vector<4x16x16xf32>
    %11 = vector.shape_cast %10 : vector<4x16x16xf32> to vector<4x256xf32>
    %12 = vector.extract_strided_slice %5 {offsets = [0, 1, 0], sizes = [4, 16, 16], strides = [1, 1, 1]} : vector<4x18x18xf32> to vector<4x16x16xf32>
    %13 = vector.shape_cast %12 : vector<4x16x16xf32> to vector<4x256xf32>
    %14 = vector.extract_strided_slice %5 {offsets = [0, 1, 1], sizes = [4, 16, 16], strides = [1, 1, 1]} : vector<4x18x18xf32> to vector<4x16x16xf32>
    %15 = vector.shape_cast %14 : vector<4x16x16xf32> to vector<4x256xf32>
    %16 = vector.extract_strided_slice %5 {offsets = [0, 1, 2], sizes = [4, 16, 16], strides = [1, 1, 1]} : vector<4x18x18xf32> to vector<4x16x16xf32>
    %17 = vector.shape_cast %16 : vector<4x16x16xf32> to vector<4x256xf32>
    %18 = vector.extract_strided_slice %5 {offsets = [0, 2, 0], sizes = [4, 16, 16], strides = [1, 1, 1]} : vector<4x18x18xf32> to vector<4x16x16xf32>
    %19 = vector.shape_cast %18 : vector<4x16x16xf32> to vector<4x256xf32>
    %20 = vector.extract_strided_slice %5 {offsets = [0, 2, 1], sizes = [4, 16, 16], strides = [1, 1, 1]} : vector<4x18x18xf32> to vector<4x16x16xf32>
    %21 = vector.shape_cast %20 : vector<4x16x16xf32> to vector<4x256xf32>
    %22 = vector.extract_strided_slice %5 {offsets = [0, 2, 2], sizes = [4, 16, 16], strides = [1, 1, 1]} : vector<4x18x18xf32> to vector<4x16x16xf32>
    %23 = vector.shape_cast %22 : vector<4x16x16xf32> to vector<4x256xf32>
    %24 = tpu.concatenate %7, %9, %11, %13, %15, %17, %19, %21, %23 in 0 : vector<4x256xf32>, vector<4x256xf32>, vector<4x256xf32>, vector<4x256xf32>, vector<4x256xf32>, vector<4x256xf32>, vector<4x256xf32>, vector<4x256xf32>, vector<4x256xf32> -> vector<36x256xf32>
    %cst_8 = arith.constant dense<0.000000e+00> : vector<8x256xf32>
    %25 = tpu.matmul %0, %24, %cst_8 {dimension_numbers = #tpu.dot_dimension_numbers<[1], [0], [0], [1], [0, 0, 1, 1], [], []>} : vector<8x36xf32>, vector<36x256xf32>, vector<8x256xf32> -> vector<8x256xf32>
    %26 = arith.addf %25, %1 : vector<8x256xf32>
    %c0_9 = arith.constant 0 : index
    %c0_10 = arith.constant 0 : index
    %c0_11 = arith.constant 0 : index
    %27 = vector.load %arg4[%c0_9, %c0_10, %c0_11] : memref<1x8x256xf32, #tpu.memory_space<vmem>>, vector<1x8x256xf32>
    %28 = vector.shape_cast %27 : vector<1x8x256xf32> to vector<8x256xf32>
    %29 = vector.shape_cast %26 : vector<8x256xf32> to vector<1x8x256xf32>
    tpu.vector_store %arg4[%c0_9, %c0_10, %c0_11], %29 {strides = array<i32>} : memref<1x8x256xf32, #tpu.memory_space<vmem>>, vector<1x8x256xf32>,
    %cst_12 = arith.constant dense<0.000000e+00> : vector<8xf32>
    %30 = vector.multi_reduction <add>, %26, %cst_12 [1] : vector<8x256xf32> to vector<8xf32>
    %31 = vector.shape_cast %30 : vector<8xf32> to vector<8x1xf32>
    %32 = arith.addf %2, %31 : vector<8x1xf32>
    %33 = arith.mulf %26, %26 : vector<8x256xf32>
    %cst_13 = arith.constant dense<0.000000e+00> : vector<8xf32>
    %34 = vector.multi_reduction <add>, %33, %cst_13 [1] : vector<8x256xf32> to vector<8xf32>
    %35 = vector.shape_cast %34 : vector<8xf32> to vector<8x1xf32>
    %36 = arith.addf %3, %35 : vector<8x1xf32>
    %c0_14 = arith.constant 0 : index
    %c0_15 = arith.constant 0 : index
    %c0_16 = arith.constant 0 : index
    %37 = vector.load %arg5[%c0_14, %c0_15, %c0_16] : memref<1x8x1xf32, #tpu.memory_space<vmem>>, vector<1x8x1xf32>
    %38 = vector.shape_cast %37 : vector<1x8x1xf32> to vector<8x1xf32>
    %39 = vector.shape_cast %32 : vector<8x1xf32> to vector<1x8x1xf32>
    tpu.vector_store %arg5[%c0_14, %c0_15, %c0_16], %39 {strides = array<i32>} : memref<1x8x1xf32, #tpu.memory_space<vmem>>, vector<1x8x1xf32>,
    %c0_17 = arith.constant 0 : index
    %c0_18 = arith.constant 0 : index
    %c0_19 = arith.constant 0 : index
    %40 = vector.load %arg6[%c0_17, %c0_18, %c0_19] : memref<1x8x1xf32, #tpu.memory_space<vmem>>, vector<1x8x1xf32>
    %41 = vector.shape_cast %40 : vector<1x8x1xf32> to vector<8x1xf32>
    %42 = vector.shape_cast %36 : vector<8x1xf32> to vector<1x8x1xf32>
    tpu.vector_store %arg6[%c0_17, %c0_18, %c0_19], %42 {strides = array<i32>} : memref<1x8x1xf32, #tpu.memory_space<vmem>>, vector<1x8x1xf32>,
    return
  }
  func.func @transform_0(%arg0: i32) -> (i32, i32, i32, i32) {
    %c0_i32 = arith.constant 0 : i32
    %c0_i32_0 = arith.constant 0 : i32
    %c0_i32_1 = arith.constant 0 : i32
    %c0_i32_2 = arith.constant 0 : i32
    return %arg0, %c0_i32, %c0_i32_0, %c0_i32_1 : i32, i32, i32, i32
  }
  func.func @transform_1(%arg0: i32) -> (i32, i32) {
    %c0_i32 = arith.constant 0 : i32
    %c0_i32_0 = arith.constant 0 : i32
    %c0_i32_1 = arith.constant 0 : i32
    return %c0_i32, %c0_i32_0 : i32, i32
  }
  func.func @transform_2(%arg0: i32) -> (i32, i32) {
    %c0_i32 = arith.constant 0 : i32
    %c0_i32_0 = arith.constant 0 : i32
    %c0_i32_1 = arith.constant 0 : i32
    return %c0_i32, %c0_i32_0 : i32, i32
  }
  func.func @transform_3(%arg0: i32) -> (i32, i32, i32) {
    %c0_i32 = arith.constant 0 : i32
    %c0_i32_0 = arith.constant 0 : i32
    %c0_i32_1 = arith.constant 0 : i32
    return %arg0, %c0_i32, %c0_i32_0 : i32, i32, i32
  }
  func.func @transform_4(%arg0: i32) -> (i32, i32, i32) {
    %c0_i32 = arith.constant 0 : i32
    %c0_i32_0 = arith.constant 0 : i32
    %c0_i32_1 = arith.constant 0 : i32
    return %arg0, %c0_i32, %c0_i32_0 : i32, i32, i32
  }
  func.func @transform_5(%arg0: i32) -> (i32, i32, i32) {
    %c0_i32 = arith.constant 0 : i32
    %c0_i32_0 = arith.constant 0 : i32
    %c0_i32_1 = arith.constant 0 : i32
    return %arg0, %c0_i32, %c0_i32_0 : i32, i32, i32
  }
}

module attributes {stable_mosaic.version = 11 : i64} {
  func.func @bn_relu_kernel(%arg0: i32, %arg1: memref<1x8x256xf32, #tpu.memory_space<vmem>>, %arg2: memref<8x1xf32, #tpu.memory_space<vmem>>, %arg3: memref<8x1xf32, #tpu.memory_space<vmem>>, %arg4: memref<1x8x256xf32, #tpu.memory_space<vmem>>) attributes {dimension_semantics = [#tpu.dimension_semantics<parallel>], iteration_bounds = array<i64: 2>, scalar_prefetch = 0 : i64, scratch_operands = 0 : i64, tpu.core_type = #tpu.core_type<tc>, window_params = [{transform_indices = @transform_0, window_bounds = array<i64: 1, 8, 256>}, {pipeline_mode = #tpu.pipeline_mode<synchronous>, transform_indices = @transform_1, window_bounds = array<i64: 8, 1>}, {pipeline_mode = #tpu.pipeline_mode<synchronous>, transform_indices = @transform_2, window_bounds = array<i64: 8, 1>}, {transform_indices = @transform_3, window_bounds = array<i64: 1, 8, 256>}]} {
    %c0 = arith.constant 0 : index
    %c0_0 = arith.constant 0 : index
    %c0_1 = arith.constant 0 : index
    %0 = vector.load %arg1[%c0, %c0_0, %c0_1] : memref<1x8x256xf32, #tpu.memory_space<vmem>>, vector<1x8x256xf32>
    %c0_2 = arith.constant 0 : index
    %c0_3 = arith.constant 0 : index
    %1 = vector.load %arg2[%c0_2, %c0_3] : memref<8x1xf32, #tpu.memory_space<vmem>>, vector<8x1xf32>
    %2 = vector.shape_cast %1 : vector<8x1xf32> to vector<1x8x1xf32>
    %3 = vector.broadcast %2 : vector<1x8x1xf32> to vector<1x8x256xf32>
    %4 = arith.mulf %0, %3 : vector<1x8x256xf32>
    %c0_4 = arith.constant 0 : index
    %c0_5 = arith.constant 0 : index
    %5 = vector.load %arg3[%c0_4, %c0_5] : memref<8x1xf32, #tpu.memory_space<vmem>>, vector<8x1xf32>
    %6 = vector.shape_cast %5 : vector<8x1xf32> to vector<1x8x1xf32>
    %7 = vector.broadcast %6 : vector<1x8x1xf32> to vector<1x8x256xf32>
    %8 = arith.addf %4, %7 : vector<1x8x256xf32>
    %cst = arith.constant 0.000000e+00 : f32
    %9 = vector.broadcast %cst : f32 to vector<1x8x256xf32>
    %10 = arith.maximumf %8, %9 : vector<1x8x256xf32>
    %c0_6 = arith.constant 0 : index
    %c0_7 = arith.constant 0 : index
    %c0_8 = arith.constant 0 : index
    %11 = vector.load %arg4[%c0_6, %c0_7, %c0_8] : memref<1x8x256xf32, #tpu.memory_space<vmem>>, vector<1x8x256xf32>
    tpu.vector_store %arg4[%c0_6, %c0_7, %c0_8], %10 {strides = array<i32>} : memref<1x8x256xf32, #tpu.memory_space<vmem>>, vector<1x8x256xf32>,
    return
  }
  func.func @transform_0(%arg0: i32) -> (i32, i32, i32) {
    %c0_i32 = arith.constant 0 : i32
    %c0_i32_0 = arith.constant 0 : i32
    %c0_i32_1 = arith.constant 0 : i32
    return %arg0, %c0_i32, %c0_i32_0 : i32, i32, i32
  }
  func.func @transform_1(%arg0: i32) -> (i32, i32) {
    %c0_i32 = arith.constant 0 : i32
    %c0_i32_0 = arith.constant 0 : i32
    %c0_i32_1 = arith.constant 0 : i32
    return %c0_i32, %c0_i32_0 : i32, i32
  }
  func.func @transform_2(%arg0: i32) -> (i32, i32) {
    %c0_i32 = arith.constant 0 : i32
    %c0_i32_0 = arith.constant 0 : i32
    %c0_i32_1 = arith.constant 0 : i32
    return %c0_i32, %c0_i32_0 : i32, i32
  }
  func.func @transform_3(%arg0: i32) -> (i32, i32, i32) {
    %c0_i32 = arith.constant 0 : i32
    %c0_i32_0 = arith.constant 0 : i32
    %c0_i32_1 = arith.constant 0 : i32
    return %arg0, %c0_i32, %c0_i32_0 : i32, i32, i32
  }
}

</mosaic_0001>

<bundles_post_ra>
// kernel: coord_conv.3
= control target key start
LH: loop header
LB: loop body
LE: loop exit
PB: predicated region body
PF: predicated region fallthrough
CT: control target
= control target key end

     0   :  { %s300_s12 = smov 0   ;;  %s323_s0 = inlined_call_operand.vmem [shape: f32[2,8,256], index: 0, kind: input, shape index: {}, may-alias: {0,3}]   ;;  %s324_s1 = inlined_call_operand.vmem [shape: f32[8,1], index: 1, kind: input, shape index: {}]   ;;  %s325_s2 = inlined_call_operand.vmem [shape: f32[8,1], index: 2, kind: input, shape index: {}]   ;;  %s326_s3 = inlined_call_operand.vmem [shape: f32[2,8,256], index: 3, kind: output, shape index: {}, may-alias: {0,3}]  }
   0x1 LB: > { %s248_s13 = sadd.s32 4294967295, %s277_s12   ;;  %p252_p0 = scmp.ge.s32.totalorder %s277_s12, 1  ;;  %s277_s12 = sphi %s300_s12, %s13_s12  }
   0x2   : > { %p137_p1 = scmp.lt.s32.totalorder %s277_s12, 3 }
   0x4   : > { %p138_p2 = pnand %p252_p0, %p137_p1 }
   0x5   : > { %p161_p3 = scmp.lt.s32.totalorder (!%p138_p2), %s248_s13, 1 }
   0x6   : > { %141 = sbr.rel (%p138_p2) target bundleno = 142 (0x8e), region = 32 }
   0xb   : > { %v173_v0 = vld [vmem:[%s324_s1] sm:$0xff]  ;;  %v279_v1 = vmov 0   ;;  %s328_s13 = smov (!%p161_p3, %s248_s13), 1 }
   0xc   : > { %270 = vset.pattern.permute.xlu0 %v279_v1  ;;  %v181_v2 = vld [vmem:[%s325_s2] sm:$0xff]  ;;  %s259_s18 = sshll.u32 %s328_s13, 4 }
   0xd   : > { %176 = vperm.xlu0 %270, %v173_v0   ;;  %s165_s21 = scalar_lea.vmem %s323_s0, %s259_s18  ;;  %s170_s24 = scalar_lea.vmem %s326_s3, %s259_s18 }
   0xe   : > { %v171_v4 = vld [vmem:[%s165_s21] sm:$0xff]  ;;  %v172_v5 = vld [vmem:[%s165_s21 + $0x8] sm:$0xff] }
  0x15   : > { %184 = vperm.xlu0 %270, %v181_v2  }
  0x7f   : > { %v177_v3 = vpop.permute.xlu0 %176 }
  0x80   : > { %v179_v6 = vmul.f32 %v177_v3, %v171_v4  ;;  %v180_v7 = vmul.f32 %v177_v3, %v172_v5 }
  0x87   : > { %v185_v8 = vpop.permute.xlu0 %184 }
  0x88   : > { %v187_v9 = vadd.f32 %v185_v8, %v179_v6  ;;  %v188_v10 = vadd.f32 %v185_v8, %v180_v7 }
  0x8a   : > { %v189_v11 = vmax.f32 %v187_v9, 0.0  ;;  %v190_v12 = vmax.f32 %v188_v10, 0.0 }
  0x8c   : > { %191 = vst [vmem:[%s170_s24] sm:$0xff] %v189_v11 }
  0x8d   : > { %192 = vst [vmem:[%s170_s24 + $0x8] sm:$0xff] %v190_v12 }
  0x8e PF: > { %s13_s12 = sadd.s32 1, %s277_s12  }
  0x8f   : > { %p10_p4 = scmp.ge.s32.totalorder %s13_s12, 4  }
  0x91   :  { %12 = sbr.rel (!%p10_p4) target bundleno = 1 (0x1), region = 62 }

// kernel: coord_conv.2
= control target key start
LH: loop header
LB: loop body
LE: loop exit
PB: predicated region body
PF: predicated region fallthrough
CT: control target
= control target key end

     0   :  { %s2770_s18 = smov 0   ;;  %s4168_s0 = inlined_call_operand.vmem [shape: f32[2,4,18,18], index: 0, kind: input, shape index: {}]   ;;  %s4169_s1 = inlined_call_operand.vmem [shape: f32[8,36], index: 1, kind: input, shape index: {}]   ;;  %s4170_s2 = inlined_call_operand.vmem [shape: f32[8,256], index: 2, kind: input, shape index: {}]   ;;  %s4171_s3 = inlined_call_operand.vmem [shape: f32[2,8,256], index: 3, kind: output, shape index: {0}]   ;;  %s4172_s4 = inlined_call_operand.vmem [shape: f32[2,8,1], index: 4, kind: output, shape index: {1}]   ;;  %s4173_s5 = inlined_call_operand.vmem [shape: f32[2,8,1], index: 5, kind: output, shape index: {2}]  }
   0x1 LB: > { %s2336_s19 = sadd.s32 4294967295, %s2727_s18   ;;  %p2340_p0 = scmp.ge.s32.totalorder %s2727_s18, 1  ;;  %s2727_s18 = sphi %s2770_s18, %s16_s18  }
   0x2   : > { %p192_p1 = scmp.lt.s32.totalorder %s2727_s18, 3 }
   0x4   : > { %p193_p2 = pnand %p2340_p0, %p192_p1 }
   0x6   : > { %196 = sbr.rel (%p193_p2) target bundleno = 869 (0x365), region = 32 }
   0xb   : > { %p228_p3 = scmp.lt.s32.totalorder %s2336_s19, 1  ;;  %v2729_v0 = vmov 1983009808   ;;  %vm262_vm0 = vcmask 1047556   ;;  %v2730_v11 = vmov 1934713408  }
   0xc   : > { %v267_v1 = vunpack.c.l.s4 %v2729_v0  ;;  %v291_v12 = vunpack.c.l.s4 %v2730_v11  ;;  %s2731_s24 = smov 127   ;;  %s2732_s25 = smov 64   ;;  %vm875_vm1 = vcmask 1046528   ;;  %vm1498_vm2 = vcmask 1045504  }
   0xd   : > { %s4226_s19 = smov (!%p228_p3, %s2336_s19), 1  ;;  %s2733_s26 = smov 32   ;;  %vm430_vm3 = vcmask 130048   ;;  %vm432_vm4 = vcmask 261120   ;;  %vm434_vm5 = vcmask 392192   ;;  %vm436_vm6 = vcmask 523264  }
   0xe   : > { %s2353_s20 = smul.u32 96, %s4226_s19  ;;  %v2809_v10 = vunpack.c.0.s8 %v267_v1  ;;  %v2840_v31 = vunpack.c.0.s8 %v291_v12  ;;  %s2734_s27 = smov 48   ;;  %vm438_vm7 = vcmask 654336   ;;  %vm440_vm8 = vcmask 785408  }
   0xf   : > { %s2735_s28 = smov 16   ;;  %s2736_s29 = smov 96   ;;  %vm442_vm9 = vcmask 916480   ;;  %vm2145_vm10 = vcmask 1043456   ;;  %vm2154_vm11 = vcmask 293888   ;;  %vm2216_vm12 = vcmask 7168  }
  0x10   : > { %s2784_s23 = scalar_lea.vmem %s4168_s0, %s2353_s20  ;;  %s2737_s30 = smov 112  }
  0x11   : > { %v2787_v2 = vld [vmem:[%s2784_s23] sm:$0xff]  ;;  %v2790_v3 = vld [vmem:[%s2784_s23 + $0x8] sm:$0xff]  ;;  %v2793_v4 = vld [vmem:[%s2784_s23 + $0x18] sm:$0xff]  ;;  %s2738_s6 = smov 80   ;;  %s2739_s7 = smov 126  }
  0x12   : > { %v2797_v5 = vpack.i.bf16 %v2790_v3, %v2787_v2  ;;  %v2800_v6 = vld [vmem:[%s2784_s23 + $0x20] sm:$0xff]  ;;  %v2803_v7 = vld [vmem:[%s2784_s23 + $0x30] sm:$0xff]  ;;  %v2806_v8 = vld [vmem:[%s2784_s23 + $0x38] sm:$0xff]  ;;  %v264_v9 = vrot.slane %v2787_v2, 4  ;;  %v276_v15 = vrot.slane %v2793_v4, 4  ;;  %v320_v16 = vrot.slane %v2790_v3, 4 }
  0x13   : > { %v2812_v13 = vld [vmem:[%s2784_s23 + $0x48] sm:$0xff]  ;;  %v2815_v14 = vld [vmem:[%s2784_s23 + $0x50] sm:$0xff]  ;;  %v332_v17 = vrot.slane %v2800_v6, 4  ;;  %v261_v18 = vrot.slane %v2803_v7, 4  ;;  %v318_v21 = vrot.slane %v2806_v8, 4  ;;  %s2352_s10 = sshll.u32 %s4226_s19, 4 }
  0x14   : > { %2374 = vrot.lane.b32.xlu1 %v2797_v5, %s2731_s24  ;;  %v265_v19 = vsel %vm262_vm0, %v2803_v7, %v264_v9  ;;  %v274_v20 = vrot.slane %v2812_v13, 4  ;;  %v330_v22 = vrot.slane %v2815_v14, 4  ;;  %v277_v24 = vsel %vm262_vm0, %v2812_v13, %v276_v15  ;;  %s237_s17 = scalar_lea.vmem %s4171_s3, %s2352_s10  ;;  %s2344_s20 = sshll.u32 %s4226_s19, 3 }
  0x15   : > { %v273_v23 = vperm.slane %v265_v19, %v2809_v10  ;;  %v321_v25 = vsel %vm262_vm0, %v2806_v8, %v320_v16  ;;  %v333_v26 = vsel %vm262_vm0, %v2815_v14, %v332_v17  ;;  %v285_v27 = vperm.slane %v277_v24, %v2809_v10 }
  0x16   : > { %v329_v28 = vperm.slane %v321_v25, %v2809_v10  ;;  %v341_v29 = vperm.slane %v333_v26, %v2809_v10  ;;  %v263_v30 = vsel %vm262_vm0, %v261_v18, %v2787_v2  ;;  %v275_v33 = vsel %vm262_vm0, %v274_v20, %v2793_v4  ;;  %v251_v20 = vld [vmem:[%s2784_s23 + $0x10] sm:$0x3] }
  0x17   : > { %v269_v32 = vperm.slane %v263_v30, %v2809_v10  ;;  %v319_v34 = vsel %vm262_vm0, %v318_v21, %v2790_v3  ;;  %v298_v35 = vrot.slane %v285_v27, 4  ;;  %v300_v36 = vrot.slane %v273_v23, 4 }
  0x18   : > { %v354_v37 = vrot.slane %v341_v29, 4  ;;  %v281_v38 = vperm.slane %v275_v33, %v2809_v10  ;;  %v356_v39 = vrot.slane %v329_v28, 4  ;;  %v325_v41 = vperm.slane %v319_v34, %v2809_v10  ;;  %v2902_v33 = vld [vmem:[%s2784_s23 + $0x40] sm:$0x3] }
  0x19   : > { %v288_v40 = vrot.slane %v269_v32, 4  ;;  %v331_v42 = vsel %vm262_vm0, %v330_v22, %v2800_v6  ;;  %v299_v43 = vsel %vm262_vm0, %v298_v35, %v273_v23  ;;  %v301_v54 = vsel %vm262_vm0, %v285_v27, %v300_v36 }
  0x1a   : > { %v355_v44 = vsel %vm262_vm0, %v354_v37, %v329_v28  ;;  %v286_v45 = vrot.slane %v281_v38, 4  ;;  %v337_v46 = vperm.slane %v331_v42, %v2809_v10  ;;  %v305_v47 = vperm.slane %v299_v43, %v2840_v31  ;;  %v2897_v28 = vld [vmem:[%s2784_s23 + $0x28] sm:$0x3] }
  0x1b   : > { %v2856_v48 = vperm.slane %v355_v44, %v2840_v31  ;;  %v289_v49 = vsel %vm262_vm0, %v281_v38, %v288_v40  ;;  %v344_v50 = vrot.slane %v325_v41, 4  ;;  %v309_v58 = vperm.slane %v301_v54, %v2840_v31 }
  0x1c   : > { %v297_v51 = vperm.slane %v289_v49, %v2840_v31  ;;  %v342_v52 = vrot.slane %v337_v46, 4  ;;  %v287_v53 = vsel %vm262_vm0, %v286_v45, %v269_v32  ;;  %v357_v62 = vsel %vm262_vm0, %v341_v29, %v356_v39 }
  0x1d   : > { %v2388_v55 = vpack.i.bf16 %v2856_v48, %v305_v47  ;;  %v345_v56 = vsel %vm262_vm0, %v337_v46, %v344_v50  ;;  %v2865_v57 = vperm.slane %v287_v53, %v2840_v31  ;;  %v365_v1 = vperm.slane %v357_v62, %v2840_v31 }
  0x1e   : > { %v353_v59 = vperm.slane %v345_v56, %v2840_v31  ;;  %v312_v60 = vrot.slane %v297_v51, 4  ;;  %v343_v61 = vsel %vm262_vm0, %v342_v52, %v325_v41  ;;  %v2880_v15 = vpack.i.bf16 %v2800_v6, %v2793_v4 }
  0x1f   : > { %2389 = vrot.lane.b32.xlu1 %v2388_v55, %s2732_s25  ;;  %v310_v63 = vrot.slane %v2865_v57, 4  ;;  %v2874_v0 = vperm.slane %v343_v61, %v2840_v31  ;;  %v316_v17 = vrot.slane %v309_v58, 4  ;;  %v372_v18 = vrot.slane %v365_v1, 4 }
  0x20   : > { %v368_v9 = vrot.slane %v353_v59, 4  ;;  %v2383_v11 = vpack.i.bf16 %v353_v59, %v297_v51  ;;  %v313_v12 = vsel %vm262_vm0, 0.0, %v312_v60  ;;  %2379 = vrot.lane.b32.xlu2 %v2880_v15, %s2731_s24  ;;  %v314_v24 = vrot.slane %v305_v47, 4 }
  0x21   : > { %v366_v16 = vrot.slane %v2874_v0, 4  ;;  %v311_v22 = vsel %vm262_vm0, 0.0, %v310_v63  ;;  %v877_v25 = vrot.slane %v2790_v3, 1  ;;  %v876_v26 = vrot.slane %v2787_v2, 1  ;;  %v2906_v3 = vld [vmem:[%s2784_s23 + $0x58] sm:$0x3] }
  0x22   : > { %2384 = vrot.lane.b32.xlu0 %v2383_v11, %s2733_s26  ;;  %v369_v19 = vsel %vm262_vm0, 0.0, %v368_v9  ;;  %v2894_v27 = vpack.i.bf16 %v2815_v14, %v2812_v13  ;;  %v317_v29 = vsel %vm262_vm0, 0.0, %v316_v17  ;;  %v373_v30 = vsel %vm262_vm0, 0.0, %v372_v18 }
  0x23   : > { %v2403_v21 = vpack.i.bf16 %v369_v19, %v313_v12  ;;  %v367_v23 = vsel %vm262_vm0, 0.0, %v366_v16  ;;  %v2393_v32 = vpack.i.bf16 %v365_v1, %v309_v58  ;;  %v879_v34 = vrot.slane %v251_v20, 1 }
  0x24   : > { %v2398_v35 = vpack.i.bf16 %v367_v23, %v311_v22  ;;  %v370_v36 = vrot.slane %v2856_v48, 4  ;;  %v881_v2 = vrot.slane %v2793_v4, 1  ;;  %v882_v37 = vrot.slane %v2800_v6, 1 }
  0x25   : > { %v315_v38 = vsel %vm262_vm0, 0.0, %v314_v24  ;;  %v884_v39 = vrot.slane %v2897_v28, 1  ;;  %v886_v40 = vrot.slane %v2803_v7, 1  ;;  %v2915_v41 = vsel %vm875_vm1, %v876_v26, %v877_v25 }
  0x26   : > { %v887_v42 = vrot.slane %v2806_v8, 1  ;;  %v889_v43 = vrot.slane %v2902_v33, 1  ;;  %v891_v44 = vrot.slane %v2812_v13, 1  ;;  %v2921_v45 = vsel %vm875_vm1, %v877_v25, %v879_v34 }
  0x27   : > { %2404 = vrot.lane.b32.xlu1 %v2403_v21, %s2734_s27  ;;  %v2924_v46 = vsel %vm875_vm1, %v881_v2, %v882_v37  ;;  %v892_v47 = vrot.slane %v2815_v14, 1  ;;  %v894_v48 = vrot.slane %v2906_v3, 1  ;;  %v371_v49 = vsel %vm262_vm0, 0.0, %v370_v36 }
  0x28   : > { %2394 = vrot.lane.b32.xlu2 %v2393_v32, %s2736_s29  ;;  %v2932_v50 = vsel %vm875_vm1, %v882_v37, %v884_v39  ;;  %v2935_v51 = vsel %vm875_vm1, %v886_v40, %v887_v42  ;;  %v2938_v52 = vsel %vm875_vm1, %v887_v42, %v889_v43  ;;  %v2413_v58 = vpack.i.bf16 %v373_v30, %v317_v29 }
  0x29   : > { %v2941_v53 = vsel %vm875_vm1, %v891_v44, %v892_v47  ;;  %v2944_v54 = vsel %vm875_vm1, %v892_v47, %v894_v48  ;;  %v904_v55 = vrot.slane %v2935_v51, 4  ;;  %v960_v56 = vrot.slane %v2938_v52, 4 }
  0x2a   : > { %2399 = vrot.lane.b32.xlu0 %v2398_v35, %s2735_s28  ;;  %v916_v59 = vrot.slane %v2941_v53, 4  ;;  %v972_v60 = vrot.slane %v2944_v54, 4  ;;  %v2408_v61 = vpack.i.bf16 %v371_v49, %v315_v38  ;;  %v906_v1 = vrot.slane %v2915_v41, 4 }
  0x2b   : > { %v905_v62 = vsel %vm262_vm0, %v904_v55, %v2915_v41  ;;  %v961_v63 = vsel %vm262_vm0, %v960_v56, %v2921_v45  ;;  %v918_v19 = vrot.slane %v2924_v46, 4  ;;  %v962_v22 = vrot.slane %v2921_v45, 4 }
  0x2c   : > { %v911_v9 = vperm.slane %v905_v62, %v2809_v10  ;;  %v917_v11 = vsel %vm262_vm0, %v916_v59, %v2924_v46  ;;  %v967_v12 = vperm.slane %v961_v63, %v2809_v10  ;;  %v973_v16 = vsel %vm262_vm0, %v972_v60, %v2932_v50 }
  0x2d   : > { %v923_v17 = vperm.slane %v917_v11, %v2809_v10  ;;  %v979_v18 = vperm.slane %v973_v16, %v2809_v10  ;;  %v974_v24 = vrot.slane %v2932_v50, 4  ;;  %v907_v26 = vsel %vm262_vm0, %v2935_v51, %v906_v1 }
  0x2e   : > { %v930_v20 = vrot.slane %v911_v9, 4  ;;  %v986_v21 = vrot.slane %v967_v12, 4  ;;  %v963_v32 = vsel %vm262_vm0, %v2938_v52, %v962_v22  ;;  %v2418_v34 = vpack.i.bf16 %v2806_v8, %v2803_v7 }
  0x2f   : > { %2424 = vrot.lane.b32.xlu1 %v2894_v27, %s2731_s24  ;;  %v919_v35 = vsel %vm262_vm0, %v2941_v53, %v918_v19  ;;  %v928_v36 = vrot.slane %v923_v17, 4  ;;  %v915_v38 = vperm.slane %v907_v26, %v2809_v10  ;;  %v984_v39 = vrot.slane %v979_v18, 4 }
  0x30   : > { %2409 = vrot.lane.b32.xlu2 %v2408_v61, %s2738_s6  ;;  %v931_v23 = vsel %vm262_vm0, %v923_v17, %v930_v20  ;;  %v987_v25 = vsel %vm262_vm0, %v979_v18, %v986_v21  ;;  %v971_v40 = vperm.slane %v963_v32, %v2809_v10  ;;  %v975_v42 = vsel %vm262_vm0, %v2944_v54, %v974_v24 }
  0x31   : > { %v939_v29 = vperm.slane %v931_v23, %v2840_v31  ;;  %v995_v30 = vperm.slane %v987_v25, %v2840_v31  ;;  %v942_v47 = vrot.slane %v915_v38, 4  ;;  %v927_v49 = vperm.slane %v919_v35, %v2809_v10 }
  0x32   : > { %2414 = vrot.lane.b32.xlu0 %v2413_v58, %s2737_s30  ;;  %v998_v48 = vrot.slane %v971_v40, 4  ;;  %v983_v55 = vperm.slane %v975_v42, %v2809_v10  ;;  %v929_v56 = vsel %vm262_vm0, %v928_v36, %v911_v9  ;;  %v985_v58 = vsel %vm262_vm0, %v984_v39, %v967_v12 }
  0x33   : > { %v954_v2 = vrot.slane %v939_v29, 4  ;;  %v1010_v37 = vrot.slane %v995_v30, 4  ;;  %v3000_v60 = vperm.slane %v985_v58, %v2840_v31  ;;  %v943_v61 = vsel %vm262_vm0, %v927_v49, %v942_v47 }
  0x34   : > { %v999_v62 = vsel %vm262_vm0, %v983_v55, %v998_v48  ;;  %v940_v63 = vrot.slane %v927_v49, 4  ;;  %v996_v1 = vrot.slane %v983_v55, 4  ;;  %v951_v9 = vperm.slane %v943_v61, %v2840_v31 }
  0x35   : > { %v955_v43 = vsel %vm262_vm0, 0.0, %v954_v2  ;;  %v1011_v44 = vsel %vm262_vm0, 0.0, %v1010_v37  ;;  %v1008_v16 = vrot.slane %v3000_v60, 4  ;;  %v1007_v12 = vperm.slane %v999_v62, %v2840_v31 }
  0x36   : > { %v2458_v59 = vpack.i.bf16 %v1011_v44, %v955_v43  ;;  %v941_v20 = vsel %vm262_vm0, %v940_v63, %v915_v38  ;;  %v997_v21 = vsel %vm262_vm0, %v996_v1, %v971_v40  ;;  %v958_v26 = vrot.slane %v951_v9, 4 }
  0x37   : > { %2434 = vrot.lane.b32.xlu1 %v2880_v15, %s2739_s7  ;;  %v2997_v15 = vperm.slane %v929_v56, %v2840_v31  ;;  %v1009_v18 = vsel %vm262_vm0, 0.0, %v1008_v16  ;;  %v2473_v22 = vpack.i.bf16 %v1007_v12, %v951_v9  ;;  %v947_v23 = vperm.slane %v941_v20, %v2840_v31 }
  0x38   : > { %2439 = vrot.lane.b32.xlu2 %v2418_v34, %s2739_s7  ;;  %v1003_v24 = vperm.slane %v997_v21, %v2840_v31  ;;  %v1014_v32 = vrot.slane %v1007_v12, 4  ;;  %v2453_v36 = vpack.i.bf16 %v995_v30, %v939_v29  ;;  %v3036_v39 = vpack.i.bf16 %v2938_v52, %v2935_v51 }
  0x39   : > { %v952_v11 = vrot.slane %v2997_v15, 4  ;;  %v956_v37 = vrot.slane %v947_v23, 4  ;;  %v3043_v29 = vpack.i.bf16 %v2921_v45, %v2915_v41  ;;  %v2498_v30 = vpack.i.bf16 %v2944_v54, %v2941_v53 }
  0x3a   : > { %2419 = vrot.lane.b32.xlu0 %v2418_v34, %s2731_s24  ;;  %v2463_v25 = vpack.i.bf16 %v1003_v24, %v947_v23  ;;  %v959_v34 = vsel %vm262_vm0, 0.0, %v958_v26  ;;  %v1015_v35 = vsel %vm262_vm0, 0.0, %v1014_v32  ;;  %v1012_v38 = vrot.slane %v1003_v24, 4 }
  0x3b   : > { %v953_v17 = vsel %vm262_vm0, 0.0, %v952_v11  ;;  %v2478_v2 = vpack.i.bf16 %v1015_v35, %v959_v34  ;;  %v1514_v51 = vrot.slane %v2812_v13, 2  ;;  %v1515_v52 = vrot.slane %v2815_v14, 2 }
  0x3c   : > { %v2448_v19 = vpack.i.bf16 %v1009_v18, %v953_v17  ;;  %v1517_v40 = vrot.slane %v2906_v3, 2  ;;  %v1504_v14 = vrot.slane %v2793_v4, 2  ;;  %v1505_v3 = vrot.slane %v2800_v6, 2 }
  0x3d   : > { %v3054_v42 = vsel %vm1498_vm2, %v1514_v51, %v1515_v52  ;;  %v1507_v53 = vrot.slane %v2897_v28, 2  ;;  %v1509_v4 = vrot.slane %v2803_v7, 2  ;;  %v1510_v6 = vrot.slane %v2806_v8, 2 }
  0x3e   : > { %v3057_v41 = vsel %vm1498_vm2, %v1515_v52, %v1517_v40  ;;  %v3075_v43 = vsel %vm1498_vm2, %v1504_v14, %v1505_v3  ;;  %v1512_v28 = vrot.slane %v2902_v33, 2 }
  0x3f   : > { %2459 = vrot.lane.b32.xlu1 %v2458_v59, %s2734_s27  ;;  %v2503_v45 = vpack.i.bf16 %v3057_v41, %v3054_v42  ;;  %v3078_v44 = vsel %vm1498_vm2, %v1505_v3, %v1507_v53  ;;  %v3089_v49 = vsel %vm1498_vm2, %v1509_v4, %v1510_v6 }
  0x40   : > { %2449 = vrot.lane.b32.xlu2 %v2448_v19, %s2735_s28  ;;  %v2513_v47 = vpack.i.bf16 %v3078_v44, %v3075_v43  ;;  %v3092_v55 = vsel %vm1498_vm2, %v1510_v6, %v1512_v28 }
  0x41   : > { %v2518_v56 = vpack.i.bf16 %v3092_v55, %v3089_v49 }
  0x42   : > { %2429 = vrot.lane.b32.xlu0 %v2797_v5, %s2739_s7  ;;  %v3024_v5 = vpack.i.bf16 %v2932_v50, %v2924_v46  ;;  %v1013_v46 = vsel %vm262_vm0, 0.0, %v1012_v38 }
  0x47   : > { %2474 = vrot.lane.b32.xlu1 %v2473_v22, %s2736_s29 }
  0x48   : > { %2464 = vrot.lane.b32.xlu2 %v2463_v25, %s2732_s25 }
  0x4a   : > { %2444 = vrot.lane.b32.xlu0 %v2894_v27, %s2739_s7  ;;  %v957_v27 = vsel %vm262_vm0, 0.0, %v956_v37 }
  0x4b   : > { %v2468_v50 = vpack.i.bf16 %v1013_v46, %v957_v27 }
  0x4f   : > { %2489 = vrot.lane.b32.xlu1 %v3024_v5, %s2731_s24 }
  0x50   : > { %2479 = vrot.lane.b32.xlu2 %v2478_v2, %s2737_s30 }
  0x52   : > { %2454 = vrot.lane.b32.xlu0 %v2453_v36, %s2733_s26 }
  0x57   : > { %1929 = vrot.lane.b32.xlu1 %v3057_v41, %s2739_s7 }
  0x58   : > { %2494 = vrot.lane.b32.xlu2 %v3036_v39, %s2731_s24 }
  0x5a   : > { %2469 = vrot.lane.b32.xlu0 %v2468_v50, %s2738_s6 }
  0x5f   : > { %2519 = vrot.lane.b32.xlu1 %v2518_v56, %s2731_s24 }
  0x60   : > { %2504 = vrot.lane.b32.xlu2 %v2503_v45, %s2731_s24 }
  0x62   : > { %2484 = vrot.lane.b32.xlu0 %v3043_v29, %s2731_s24 }
  0x68   : > { %2509 = vrot.lane.b32.xlu2 %v2498_v30, %s2739_s7 }
  0x6a   : > { %2499 = vrot.lane.b32.xlu0 %v2498_v30, %s2731_s24 }
  0x70   : > { %1919 = vrot.lane.b32.xlu2 %v3075_v43, %s2739_s7 }
  0x72   : > { %1927 = vrot.lane.b32.xlu0 %v3054_v42, %s2739_s7 }
  0x7a   : > { %v3066_v13 = vpop.permute.xlu2 %2379  ;;  %2514 = vrot.lane.b32.xlu0 %v2513_v47, %s2731_s24 }
  0x7b   : > { %v2382_v24 = vunpack.i.h.bf16 %v3066_v13 }
  0x7d   : > { %v553_v38 = vrot.slane %v2382_v24, 4 }
  0x82   : > { %v3086_v48 = vpop.permute.xlu2 %2394 }
  0x83   : > { %v2397_v51 = vunpack.i.h.bf16 %v3086_v48  ;;  %v2396_v52 = vunpack.i.l.bf16 %v3086_v48 }
  0x86   : > { %v3071_v54 = vpop.permute.xlu1 %2374 }
  0x87   : > { %v2377_v37 = vunpack.i.h.bf16 %v3071_v54  ;;  %v2376_v30 = vunpack.i.l.bf16 %v3071_v54 }
  0x89   : > { %v541_v14 = vrot.slane %v2377_v37, 4  ;;  %v485_v56 = vrot.slane %v2376_v30, 4 }
  0x8a   : > { %v2410_v8 = vpop.permute.xlu2 %2409 }
  0x8b   : > { %v2412_v19 = vunpack.i.h.bf16 %v2410_v8  ;;  %v2411_v20 = vunpack.i.l.bf16 %v2410_v8 }
  0x91   : > { %v2390_v58 = vpop.permute.xlu1 %2389 }
  0x92   : > { %v2392_v11 = vunpack.i.h.bf16 %v2390_v58  ;;  %v2391_v16 = vunpack.i.l.bf16 %v2390_v58  ;;  %v3105_v23 = vpop.permute.xlu2 %2439 }
  0x93   : > { %v2442_v40 = vunpack.i.h.bf16 %v3105_v23  ;;  %v2441_v45 = vunpack.i.l.bf16 %v3105_v23 }
  0x94   : > { %v2385_v7 = vpop.permute.xlu0 %2384 }
  0x95   : > { %v2387_v9 = vunpack.i.h.bf16 %v2385_v7  ;;  %v2386_v12 = vunpack.i.l.bf16 %v2385_v7 }
  0x99   : > { %v2405_v33 = vpop.permute.xlu1 %2404 }
  0x9a   : > { %v2407_v61 = vunpack.i.h.bf16 %v2405_v33  ;;  %v2406_v62 = vunpack.i.l.bf16 %v2405_v33  ;;  %v745_v33 = vrot.slane %v2442_v40, 4 }
  0x9c   : > { %v2400_v59 = vpop.permute.xlu0 %2399 }
  0x9d   : > { %v2402_v63 = vunpack.i.h.bf16 %v2400_v59  ;;  %v2401_v1 = vunpack.i.l.bf16 %v2400_v59  ;;  %v689_v59 = vrot.slane %v2441_v45, 4 }
  0x9f   : > { %v444_v17 = vsel %vm430_vm3, %v2874_v0, %v2402_v63  ;;  %v431_v18 = vsel %vm430_vm3, %v2865_v57, %v2401_v1  ;;  %v2381_v0 = vunpack.i.l.bf16 %v3066_v13  ;;  %v3121_v13 = vpop.permute.xlu2 %2449 }
  0xa0   : > { %v445_v21 = vsel %vm432_vm4, %v444_v17, %v2387_v9  ;;  %v433_v22 = vsel %vm432_vm4, %v431_v18, %v2386_v12  ;;  %v2452_v47 = vunpack.i.h.bf16 %v3121_v13 }
  0xa1   : > { %v435_v25 = vsel %vm434_vm5, %v433_v22, %v2406_v62  ;;  %v446_v26 = vsel %vm434_vm5, %v445_v21, %v2407_v61  ;;  %v2425_v34 = vpop.permute.xlu1 %2424  ;;  %v497_v46 = vrot.slane %v2381_v0, 4  ;;  %v2451_v61 = vunpack.i.l.bf16 %v3121_v13 }
  0xa2   : > { %v437_v32 = vsel %vm436_vm6, %v435_v25, %v2391_v16  ;;  %v447_v57 = vsel %vm436_vm6, %v446_v26, %v2392_v11  ;;  %v2427_v27 = vunpack.i.h.bf16 %v2425_v34  ;;  %v2426_v50 = vunpack.i.l.bf16 %v2425_v34 }
  0xa3   : > { %v439_v35 = vsel %vm438_vm7, %v437_v32, %v2411_v20  ;;  %v448_v36 = vsel %vm438_vm7, %v447_v57, %v2412_v19  ;;  %v3139_v9 = vsel %vm430_vm3, %v3000_v60, %v2452_v47 }
  0xa4   : > { %v2415_v2 = vpop.permute.xlu0 %2414  ;;  %v551_v3 = vrot.slane %v2427_v27, 4  ;;  %v554_v53 = vsel %vm262_vm0, %v2427_v27, %v553_v38  ;;  %v495_v4 = vrot.slane %v2426_v50, 4  ;;  %v498_v54 = vsel %vm262_vm0, %v2426_v50, %v497_v46 }
  0xa5   : > { %v2417_v6 = vunpack.i.h.bf16 %v2415_v2  ;;  %v2416_v28 = vunpack.i.l.bf16 %v2415_v2  ;;  %v441_v48 = vsel %vm440_vm8, %v439_v35, %v2396_v52  ;;  %v449_v58 = vsel %vm440_vm8, %v448_v36, %v2397_v51 }
  0xa6   : > { %v562_v7 = vperm.slane %v554_v53, %v2809_v10  ;;  %v552_v62 = vsel %vm262_vm0, %v551_v3, %v2382_v24  ;;  %v506_v63 = vperm.slane %v498_v54, %v2809_v10  ;;  %v496_v16 = vsel %vm262_vm0, %v495_v4, %v2381_v0 }
  0xa7   : > { %v3142_v12 = vsel %vm442_vm9, %v441_v48, %v2416_v28  ;;  %v3145_v17 = vsel %vm442_vm9, %v449_v58, %v2417_v6  ;;  %v3150_v22 = vperm.slane %v552_v62, %v2809_v10  ;;  %v3157_v0 = vperm.slane %v496_v16, %v2809_v10 }
  0xa8   : > { %v575_v24 = vrot.slane %v562_v7, 4  ;;  %v519_v32 = vrot.slane %v506_v63, 4 }
  0xa9   : > { %v3154_v26 = vpop.permute.xlu1 %2434 }
  0xaa   : > { %v2437_v50 = vunpack.i.h.bf16 %v3154_v26  ;;  %v2436_v51 = vunpack.i.l.bf16 %v3154_v26  ;;  %v507_v26 = vrot.slane %v3157_v0, 4 }
  0xac   : > { %v2420_v8 = vpop.permute.xlu0 %2419  ;;  %v703_v23 = vrot.slane %v2436_v51, 4 }
  0xad   : > { %v2422_v1 = vunpack.i.h.bf16 %v2420_v8  ;;  %v2421_v11 = vunpack.i.l.bf16 %v2420_v8 }
  0xaf   : > { %v539_v18 = vrot.slane %v2422_v1, 4  ;;  %v542_v19 = vsel %vm262_vm0, %v2422_v1, %v541_v14  ;;  %v483_v20 = vrot.slane %v2421_v11, 4  ;;  %v486_v21 = vsel %vm262_vm0, %v2421_v11, %v485_v56 }
  0xb0   : > { %v550_v25 = vperm.slane %v542_v19, %v2809_v10  ;;  %v494_v60 = vperm.slane %v486_v21, %v2809_v10  ;;  %v3200_v11 = vsel %vm430_vm3, %v2997_v15, %v2451_v61  ;;  %v759_v21 = vrot.slane %v2437_v50, 4 }
  0xb1   : > { %v540_v57 = vsel %vm262_vm0, %v539_v18, %v2377_v37  ;;  %v484_v34 = vsel %vm262_vm0, %v483_v20, %v2376_v30 }
  0xb2   : > { %v3162_v35 = vperm.slane %v540_v57, %v2809_v10  ;;  %v577_v36 = vrot.slane %v550_v25, 4  ;;  %v3165_v2 = vperm.slane %v484_v34, %v2809_v10  ;;  %v521_v38 = vrot.slane %v494_v60, 4 }
  0xb3   : > { %v520_v27 = vsel %vm262_vm0, %v519_v32, %v494_v60  ;;  %v576_v46 = vsel %vm262_vm0, %v575_v24, %v550_v25  ;;  %v2460_v25 = vpop.permute.xlu1 %2459  ;;  %v563_v60 = vrot.slane %v3150_v22, 4 }
  0xb4   : > { %v565_v37 = vrot.slane %v3162_v35, 4  ;;  %v509_v30 = vrot.slane %v3165_v2, 4  ;;  %v2430_v52 = vpop.permute.xlu0 %2429  ;;  %v526_v13 = vperm.slane %v520_v27, %v2840_v31  ;;  %v3175_v14 = vperm.slane %v576_v46, %v2840_v31 }
  0xb5   : > { %v2432_v3 = vunpack.i.h.bf16 %v2430_v52  ;;  %v2431_v53 = vunpack.i.l.bf16 %v2430_v52  ;;  %v522_v47 = vsel %vm262_vm0, %v506_v63, %v521_v38  ;;  %v578_v4 = vsel %vm262_vm0, %v562_v7, %v577_v36  ;;  %v3190_v63 = vpop.permute.xlu2 %2464 }
  0xb6   : > { %v2528_v54 = vpack.i.bf16 %v3175_v14, %v526_v13  ;;  %v3181_v6 = vperm.slane %v522_v47, %v2840_v31  ;;  %v3184_v28 = vperm.slane %v578_v4, %v2840_v31  ;;  %v510_v56 = vsel %vm262_vm0, %v3157_v0, %v509_v30 }
  0xb7   : > { %v746_v48 = vsel %vm262_vm0, %v745_v33, %v2432_v3  ;;  %v747_v58 = vrot.slane %v2432_v3, 4  ;;  %v690_v8 = vsel %vm262_vm0, %v689_v59, %v2431_v53  ;;  %v691_v62 = vrot.slane %v2431_v53, 4 }
  0xb8   : > { %v3193_v7 = vperm.slane %v746_v48, %v2809_v10  ;;  %2529 = vrot.lane.b32.xlu2 %v2528_v54, %s2732_s25  ;;  %v2533_v1 = vpack.i.bf16 %v3184_v28, %v3181_v6  ;;  %v2467_v33 = vunpack.i.h.bf16 %v3190_v63  ;;  %v3210_v18 = vperm.slane %v510_v56, %v2840_v31 }
  0xb9   : > { %v748_v59 = vsel %vm262_vm0, %v2442_v40, %v747_v58  ;;  %v692_v16 = vsel %vm262_vm0, %v2441_v45, %v691_v62  ;;  %v566_v19 = vsel %vm262_vm0, %v3150_v22, %v565_v37  ;;  %v3216_v15 = vperm.slane %v690_v8, %v2809_v10 }
  0xba   : > { %v756_v20 = vperm.slane %v748_v59, %v2809_v10  ;;  %v700_v61 = vperm.slane %v692_v16, %v2809_v10  ;;  %2534 = vrot.lane.b32.xlu1 %v2533_v1, %s2736_s29  ;;  %v535_v40 = vrot.slane %v526_v13, 4  ;;  %v3221_v45 = vperm.slane %v566_v19, %v2840_v31 }
  0xbb   : > { %v2466_v24 = vunpack.i.l.bf16 %v3190_v63  ;;  %v2462_v57 = vunpack.i.h.bf16 %v2460_v25  ;;  %v2461_v34 = vunpack.i.l.bf16 %v2460_v25  ;;  %v771_v36 = vrot.slane %v3193_v7, 4 }
  0xbc   : > { %v2445_v32 = vpop.permute.xlu0 %2444  ;;  %v2523_v38 = vpack.i.bf16 %v3221_v45, %v3210_v18  ;;  %v783_v37 = vrot.slane %v756_v20, 4  ;;  %v715_v30 = vrot.slane %v3216_v15, 4  ;;  %v727_v52 = vrot.slane %v700_v61, 4 }
  0xbd   : > { %v2447_v27 = vunpack.i.h.bf16 %v2445_v32  ;;  %v2446_v46 = vunpack.i.l.bf16 %v2445_v32  ;;  %v3231_v13 = vsel %vm262_vm0, 0.0, %v535_v40  ;;  %v508_v54 = vsel %vm262_vm0, %v507_v26, %v3165_v2  ;;  %v3244_v8 = vpop.permute.xlu2 %2479 }
  0xbe   : > { %2524 = vrot.lane.b32.xlu0 %v2523_v38, %s2733_s26  ;;  %v564_v56 = vsel %vm262_vm0, %v563_v60, %v3162_v35  ;;  %v591_v62 = vrot.slane %v3175_v14, 4  ;;  %v533_v1 = vrot.slane %v3210_v18, 4 }
  0xbf   : > { %v757_v22 = vrot.slane %v2447_v27, 4  ;;  %v760_v0 = vsel %vm262_vm0, %v2447_v27, %v759_v21  ;;  %v701_v3 = vrot.slane %v2446_v46, 4  ;;  %v704_v53 = vsel %vm262_vm0, %v2446_v46, %v703_v23 }
  0xc0   : > { %v768_v47 = vperm.slane %v760_v0, %v2809_v10  ;;  %v712_v4 = vperm.slane %v704_v53, %v2809_v10 }
  0xc1   : > { %v758_v48 = vsel %vm262_vm0, %v757_v22, %v2437_v50  ;;  %v702_v58 = vsel %vm262_vm0, %v701_v3, %v2436_v51  ;;  %v3253_v50 = vperm.slane %v508_v54, %v2840_v31  ;;  %v3256_v51 = vperm.slane %v564_v56, %v2840_v31 }
  0xc2   : > { %v764_v59 = vperm.slane %v758_v48, %v2809_v10  ;;  %v781_v16 = vrot.slane %v768_v47, 4  ;;  %v708_v19 = vperm.slane %v702_v58, %v2809_v10  ;;  %v725_v40 = vrot.slane %v712_v4, 4 }
  0xc3   : > { %v728_v2 = vsel %vm262_vm0, %v712_v4, %v727_v52  ;;  %v784_v35 = vsel %vm262_vm0, %v768_v47, %v783_v37  ;;  %v2475_v4 = vpop.permute.xlu1 %2474  ;;  %v531_v54 = vrot.slane %v3253_v50, 4  ;;  %v587_v56 = vrot.slane %v3256_v51, 4 }
  0xc4   : > { %v769_v21 = vrot.slane %v764_v59, 4  ;;  %v713_v14 = vrot.slane %v708_v19, 4  ;;  %v2455_v23 = vpop.permute.xlu0 %2454  ;;  %v3259_v18 = vperm.slane %v728_v2, %v2840_v31  ;;  %v3262_v25 = vperm.slane %v784_v35, %v2840_v31 }
  0xc5   : > { %v2457_v60 = vunpack.i.h.bf16 %v2455_v23  ;;  %v2456_v26 = vunpack.i.l.bf16 %v2455_v23  ;;  %v726_v32 = vsel %vm262_vm0, %v725_v40, %v700_v61  ;;  %v782_v38 = vsel %vm262_vm0, %v781_v16, %v756_v20  ;;  %v2495_v48 = vpop.permute.xlu2 %2494 }
  0xc6   : > { %v2548_v27 = vpack.i.bf16 %v3262_v25, %v3259_v18  ;;  %v3269_v46 = vperm.slane %v726_v32, %v2840_v31  ;;  %v3272_v37 = vperm.slane %v782_v38, %v2840_v31  ;;  %v716_v52 = vsel %vm262_vm0, %v708_v19, %v715_v30 }
  0xc7   : > { %v1080_v22 = vsel %vm432_vm4, %v3139_v9, %v2457_v60  ;;  %v1073_v0 = vsel %vm432_vm4, %v3200_v11, %v2456_v26  ;;  %v724_v61 = vperm.slane %v716_v52, %v2840_v31  ;;  %v772_v20 = vsel %vm262_vm0, %v764_v59, %v771_v36 }
  0xc8   : > { %v1074_v3 = vsel %vm434_vm5, %v1073_v0, %v2461_v34  ;;  %v1081_v53 = vsel %vm434_vm5, %v1080_v22, %v2462_v57  ;;  %2549 = vrot.lane.b32.xlu0 %v2548_v27, %s2736_s29  ;;  %v2543_v47 = vpack.i.bf16 %v3272_v37, %v3269_v46  ;;  %v780_v30 = vperm.slane %v772_v20, %v2840_v31 }
  0xc9   : > { %v1075_v9 = vsel %vm436_vm6, %v1074_v3, %v2466_v24  ;;  %v1082_v11 = vsel %vm436_vm6, %v1081_v53, %v2467_v33  ;;  %v592_v36 = vsel %vm262_vm0, 0.0, %v591_v62  ;;  %v589_v34 = vrot.slane %v3221_v45, 4 }
  0xca   : > { %2544 = vrot.lane.b32.xlu1 %v2543_v47, %s2732_s25  ;;  %v2538_v57 = vpack.i.bf16 %v780_v30, %v724_v61  ;;  %v714_v24 = vsel %vm262_vm0, %v713_v14, %v3216_v15  ;;  %v770_v63 = vsel %vm262_vm0, %v769_v21, %v3193_v7  ;;  %v2477_v58 = vunpack.i.h.bf16 %v2475_v4 }
  0xcb   : > { %v2476_v62 = vunpack.i.l.bf16 %v2475_v4  ;;  %v2563_v45 = vpack.i.bf16 %v592_v36, %v3231_v13  ;;  %v534_v59 = vsel %vm262_vm0, 0.0, %v533_v1  ;;  %v590_v40 = vsel %vm262_vm0, 0.0, %v589_v34  ;;  %v2490_v47 = vpop.permute.xlu1 %2489 }
  0xcc   : > { %2539 = vrot.lane.b32.xlu2 %v2538_v57, %s2733_s26  ;;  %v2470_v33 = vpop.permute.xlu0 %2469  ;;  %v3305_v2 = vperm.slane %v714_v24, %v2840_v31  ;;  %v532_v15 = vsel %vm262_vm0, 0.0, %v531_v54  ;;  %v2497_v35 = vunpack.i.h.bf16 %v2495_v48  ;;  %v739_v7 = vrot.slane %v724_v61, 4 }
  0xcd   : > { %v2472_v16 = vunpack.i.h.bf16 %v2470_v33  ;;  %v2471_v19 = vunpack.i.l.bf16 %v2470_v33  ;;  %v3309_v21 = vperm.slane %v770_v63, %v2840_v31  ;;  %v588_v1 = vsel %vm262_vm0, 0.0, %v587_v56 }
  0xce   : > { %v795_v23 = vrot.slane %v780_v30, 4  ;;  %v2558_v32 = vpack.i.bf16 %v590_v40, %v534_v59  ;;  %v2496_v38 = vunpack.i.l.bf16 %v2495_v48  ;;  %v737_v27 = vrot.slane %v3305_v2, 4 }
  0xcf   : > { %v1076_v14 = vsel %vm438_vm7, %v1075_v9, %v2471_v19  ;;  %v1083_v13 = vsel %vm438_vm7, %v1082_v11, %v2472_v16  ;;  %v793_v52 = vrot.slane %v3309_v21, 4  ;;  %v2553_v22 = vpack.i.bf16 %v588_v1, %v532_v15 }
  0xd0   : > { %v1077_v60 = vsel %vm440_vm8, %v1076_v14, %v2476_v62  ;;  %v1084_v26 = vsel %vm440_vm8, %v1083_v13, %v2477_v58  ;;  %2564 = vrot.lane.b32.xlu0 %v2563_v45, %s2738_s6  ;;  %v537_v0 = vrot.slane %v3181_v6, 4  ;;  %v593_v61 = vrot.slane %v3184_v28, 4 }
  0xd1   : > { %v1166_v20 = vrot.slane %v2497_v35, 4  ;;  %v740_v3 = vsel %vm262_vm0, 0.0, %v739_v7  ;;  %v796_v53 = vsel %vm262_vm0, 0.0, %v795_v23  ;;  %v2482_v30 = vunpack.i.h.bf16 %v3244_v8  ;;  %v3347_v23 = vpop.permute.xlu2 %2504 }
  0xd2   : > { %2559 = vrot.lane.b32.xlu1 %v2558_v32, %s2734_s27  ;;  %v2481_v9 = vunpack.i.l.bf16 %v3244_v8  ;;  %v1110_v11 = vrot.slane %v2496_v38, 4  ;;  %v738_v6 = vsel %vm262_vm0, 0.0, %v737_v27  ;;  %v794_v28 = vsel %vm262_vm0, 0.0, %v793_v52 }
  0xd3   : > { %v2578_v57 = vpack.i.bf16 %v796_v53, %v740_v3  ;;  %v538_v54 = vsel %vm262_vm0, 0.0, %v537_v0  ;;  %v594_v56 = vsel %vm262_vm0, 0.0, %v593_v61  ;;  %v2492_v48 = vunpack.i.h.bf16 %v2490_v47 }
  0xd4   : > { %2554 = vrot.lane.b32.xlu2 %v2553_v22, %s2735_s28  ;;  %v2485_v4 = vpop.permute.xlu0 %2484  ;;  %v2491_v33 = vunpack.i.l.bf16 %v2490_v47  ;;  %v2573_v58 = vpack.i.bf16 %v794_v28, %v738_v6  ;;  %v743_v62 = vrot.slane %v3259_v18, 4  ;;  %v3335_v45 = vsel %vm442_vm9, %v1077_v60, %v2481_v9 }
  0xd5   : > { %v2487_v36 = vunpack.i.h.bf16 %v2485_v4  ;;  %v2486_v34 = vunpack.i.l.bf16 %v2485_v4  ;;  %v799_v16 = vrot.slane %v3262_v25, 4  ;;  %v3340_v19 = vsel %vm442_vm9, %v1084_v26, %v2482_v30 }
  0xd6   : > { %v2568_v15 = vpack.i.bf16 %v594_v56, %v538_v54  ;;  %v741_v7 = vrot.slane %v3269_v46, 4  ;;  %v797_v14 = vrot.slane %v3272_v37, 4  ;;  %v1180_v13 = vrot.slane %v2492_v48, 4 }
  0xd7   : > { %v1167_v24 = vsel %vm262_vm0, %v1166_v20, %v2487_v36  ;;  %v1168_v63 = vrot.slane %v2487_v36, 4  ;;  %v1112_v8 = vrot.slane %v2486_v34, 4  ;;  %v1111_v18 = vsel %vm262_vm0, %v1110_v11, %v2486_v34 }
  0xd8   : > { %2579 = vrot.lane.b32.xlu0 %v2578_v57, %s2734_s27  ;;  %v1124_v1 = vrot.slane %v2491_v33, 4  ;;  %v1117_v46 = vperm.slane %v1111_v18, %v2809_v10  ;;  %v742_v37 = vsel %vm262_vm0, 0.0, %v741_v7  ;;  %v798_v27 = vsel %vm262_vm0, 0.0, %v797_v14 }
  0xd9   : > { %v1169_v59 = vsel %vm262_vm0, %v2497_v35, %v1168_v63  ;;  %v1113_v40 = vsel %vm262_vm0, %v2496_v38, %v1112_v8  ;;  %v744_v35 = vsel %vm262_vm0, 0.0, %v743_v62  ;;  %v800_v38 = vsel %vm262_vm0, 0.0, %v799_v16  ;;  %v3371_v8 = vpop.permute.xlu2 %2509 }
  0xda   : > { %2574 = vrot.lane.b32.xlu1 %v2573_v58, %s2735_s28  ;;  %v1121_v60 = vperm.slane %v1113_v40, %v2809_v10  ;;  %v2588_v3 = vpack.i.bf16 %v800_v38, %v744_v35  ;;  %v1136_v9 = vrot.slane %v1117_v46, 4  ;;  %v2583_v36 = vpack.i.bf16 %v798_v27, %v742_v37 }
  0xdb   : > { %v1177_v62 = vperm.slane %v1169_v59, %v2809_v10 }
  0xdc   : > { %2569 = vrot.lane.b32.xlu2 %v2568_v15, %s2737_s30  ;;  %v2500_v25 = vpop.permute.xlu0 %2499  ;;  %v1148_v30 = vrot.slane %v1121_v60, 4 }
  0xdd   : > { %v2502_v26 = vunpack.i.h.bf16 %v2500_v25  ;;  %v2501_v32 = vunpack.i.l.bf16 %v2500_v25 }
  0xdf   : > { %v1178_v52 = vrot.slane %v2502_v26, 4  ;;  %v1181_v22 = vsel %vm262_vm0, %v2502_v26, %v1180_v13  ;;  %v1122_v0 = vrot.slane %v2501_v32, 4  ;;  %v1125_v61 = vsel %vm262_vm0, %v2501_v32, %v1124_v1 }
  0xe0   : > { %v1133_v20 = vperm.slane %v1125_v61, %v2809_v10  ;;  %v1189_v34 = vperm.slane %v1181_v22, %v2809_v10  ;;  %v1204_v1 = vrot.slane %v1177_v62, 4 }
  0xe1   : > { %v1179_v53 = vsel %vm262_vm0, %v1178_v52, %v2492_v48  ;;  %v1123_v47 = vsel %vm262_vm0, %v1122_v0, %v2491_v33  ;;  %v1173_v33 = vperm.slane %v1167_v24, %v2809_v10  ;;  %v1920_v32 = vpop.permute.xlu2 %1919 }
  0xe2   : > { %v1129_v11 = vperm.slane %v1123_v47, %v2809_v10  ;;  %v1146_v4 = vrot.slane %v1133_v20, 4  ;;  %2589 = vrot.lane.b32.xlu1 %v2588_v3, %s2737_s30  ;;  %v1149_v6 = vsel %vm262_vm0, %v1133_v20, %v1148_v30  ;;  %v1185_v28 = vperm.slane %v1179_v53, %v2809_v10  ;;  %v2718_v3 = vld [vmem:[%s2784_s23] sm:$0xff]  ;;  %v2719_v47 = vld [vmem:[%s2784_s23 + $0x8] sm:$0xff] }
  0xe3   : > { %v1157_v57 = vperm.slane %v1149_v6, %v2840_v31  ;;  %v1202_v16 = vrot.slane %v1189_v34, 4  ;;  %v1192_v18 = vrot.slane %v1173_v33, 4  ;;  %v1953_v38 = vrot.slane %v1920_v32, 4  ;;  %v3438_v6 = vpop.permute.xlu1 %1929 }
  0xe4   : > { %2584 = vrot.lane.b32.xlu2 %v2583_v36, %s2738_s6  ;;  %v1137_v54 = vsel %vm262_vm0, %v1129_v11, %v1136_v9  ;;  %v1134_v56 = vrot.slane %v1129_v11, 4  ;;  %v1147_v48 = vsel %vm262_vm0, %v1146_v4, %v1121_v60  ;;  %v1190_v15 = vrot.slane %v1185_v28, 4  ;;  %v1928_v27 = vpop.permute.xlu0 %1927  ;;  %v2720_v9 = vld [vmem:[%s2784_s23 + $0x10] sm:$0x3]  ;;  %s241_s23 = scalar_lea.vmem %s4172_s4, %s2344_s20 }
  0xe5   : > { %v1145_v63 = vperm.slane %v1137_v54, %v2840_v31  ;;  %1243 = vrot.lane.b32.xlu0 %v1157_v57, %s2736_s29  ;;  %v1153_v40 = vperm.slane %v1147_v48, %v2840_v31  ;;  %v3387_v13 = vsel %vm262_vm0, %v1185_v28, %v1192_v18  ;;  %v3390_v59 = vsel %vm262_vm0, %v1202_v16, %v1177_v62 }
  0xe6   : > { %v1135_v58 = vsel %vm262_vm0, %v1134_v56, %v1117_v46  ;;  %v3384_v24 = vsel %vm262_vm0, %v1190_v15, %v1173_v33  ;;  %v3396_v60 = vsel %vm262_vm0, %v1189_v34, %v1204_v1  ;;  %v1951_v52 = vrot.slane %v1928_v27, 4 }
  0xe7   : > { %v1160_v7 = vrot.slane %v1145_v63, 4  ;;  %v3379_v14 = vperm.slane %v1135_v58, %v2840_v31  ;;  %v1162_v26 = vrot.slane %v1153_v40, 4  ;;  %v3403_v22 = vsel %vm262_vm0, %v1928_v27, %v1953_v38 }
  0xe8   : > { %v1164_v0 = vrot.slane %v1157_v57, 4  ;;  %v3408_v61 = vsel %vm262_vm0, %v1951_v52, %v1920_v32  ;;  %v1499_v53 = vrot.slane %v2718_v3, 2  ;;  %v1500_v30 = vrot.slane %v2719_v47, 2 }
  0xe9   : > { %v1161_v25 = vsel %vm262_vm0, 0.0, %v1160_v7  ;;  %v1158_v35 = vrot.slane %v3379_v14, 4  ;;  %v1163_v37 = vsel %vm262_vm0, 0.0, %v1162_v26  ;;  %v1502_v11 = vrot.slane %v2720_v9, 2 }
  0xea   : > { %1235 = vrot.lane.b32.xlu1 %v1153_v40, %s2732_s25  ;;  %v1165_v20 = vsel %vm262_vm0, 0.0, %v1164_v0  ;;  %v3418_v4 = vsel %vm1498_vm2, %v1499_v53, %v1500_v30 }
  0xeb   : > { %v1159_v46 = vsel %vm262_vm0, 0.0, %v1158_v35  ;;  %v3421_v36 = vsel %vm1498_vm2, %v1500_v30, %v1502_v11  ;;  %v3442_v54 = vpop.permute.xlu1 %2519 }
  0xec   : > { %1227 = vrot.lane.b32.xlu2 %v1145_v63, %s2733_s26  ;;  %v2603_v34 = vpack.i.bf16 %v3421_v36, %v3418_v4  ;;  %v3440_v57 = vpop.permute.xlu0 %2514 }
  0xed   : > { %1231 = vrot.lane.b32.xlu0 %v1161_v25, %s2734_s27 }
  0xf2   : > { %1223 = vrot.lane.b32.xlu1 %v1159_v46, %s2735_s28 }
  0xf4   : > { %1239 = vrot.lane.b32.xlu2 %v1163_v37, %s2738_s6 }
  0xf5   : > { %1921 = vrot.lane.b32.xlu0 %v3078_v44, %s2739_s7 }
  0xfa   : > { %1247 = vrot.lane.b32.xlu1 %v1165_v20, %s2737_s30 }
  0xfc   : > { %1925 = vrot.lane.b32.xlu2 %v3092_v55, %s2739_s7 }
  0xfd   : > { %2594 = vrot.lane.b32.xlu0 %v3024_v5, %s2739_s7 }
 0x102   : > { %1923 = vrot.lane.b32.xlu1 %v3089_v49, %s2739_s7 }
 0x104   : > { %2604 = vrot.lane.b32.xlu2 %v2603_v34, %s2731_s24 }
 0x105   : > { %1915 = vrot.lane.b32.xlu0 %v3418_v4, %s2739_s7 }
 0x10a   : > { %2599 = vrot.lane.b32.xlu1 %v3036_v39, %s2739_s7 }
 0x10c   : > { %2609 = vrot.lane.b32.xlu2 %v3043_v29, %s2739_s7 }
 0x112   : > { %1917 = vrot.lane.b32.xlu1 %v3421_v36, %s2739_s7  ;;  %v2530_v5 = vpop.permute.xlu2 %2529 }
 0x113   : > { %v2531_v38 = vunpack.i.l.bf16 %v2530_v5 }
 0x126   : > { %v2540_v28 = vpop.permute.xlu2 %2539 }
 0x127   : > { %v2542_v3 = vunpack.i.h.bf16 %v2540_v28  ;;  %v2541_v53 = vunpack.i.l.bf16 %v2540_v28 }
 0x12c   : > { %v2535_v16 = vpop.permute.xlu1 %2534 }
 0x12d   : > { %v2537_v47 = vunpack.i.h.bf16 %v2535_v16  ;;  %v2536_v30 = vunpack.i.l.bf16 %v2535_v16 }
 0x12e   : > { %v2555_v56 = vpop.permute.xlu2 %2554 }
 0x12f   : > { %v2557_v48 = vunpack.i.h.bf16 %v2555_v56  ;;  %v2556_v63 = vunpack.i.l.bf16 %v2555_v56 }
 0x130   : > { %v2525_v33 = vpop.permute.xlu0 %2524 }
 0x131   : > { %v658_v39 = vsel %vm430_vm3, %v3256_v51, %v2557_v48  ;;  %v651_v29 = vsel %vm430_vm3, %v3253_v50, %v2556_v63  ;;  %v2527_v58 = vunpack.i.h.bf16 %v2525_v33  ;;  %v2526_v62 = vunpack.i.l.bf16 %v2525_v33 }
 0x132   : > { %v2532_v50 = vunpack.i.h.bf16 %v2530_v5 }
 0x133   : > { %v652_v40 = vsel %vm432_vm4, %v651_v29, %v2526_v62  ;;  %v659_v15 = vsel %vm432_vm4, %v658_v39, %v2527_v58 }
 0x136   : > { %v2570_v7 = vpop.permute.xlu2 %2569 }
 0x137   : > { %v2572_v48 = vunpack.i.h.bf16 %v2570_v7  ;;  %v2571_v63 = vunpack.i.l.bf16 %v2570_v7 }
 0x13a   : > { %v3450_v18 = vpop.permute.xlu0 %2549 }
 0x13c   : > { %v3452_v1 = vpop.permute.xlu1 %2544 }
 0x13e   : > { %v3454_v25 = vpop.permute.xlu2 %2584 }
 0x142   : > { %v2565_v35 = vpop.permute.xlu0 %2564 }
 0x143   : > { %v2567_v11 = vunpack.i.h.bf16 %v2565_v35  ;;  %v2566_v34 = vunpack.i.l.bf16 %v2565_v35 }
 0x144   : > { %v2560_v51 = vpop.permute.xlu1 %2559 }
 0x145   : > { %v2562_v26 = vunpack.i.h.bf16 %v2560_v51  ;;  %v2561_v32 = vunpack.i.l.bf16 %v2560_v51 }
 0x146   : > { %v3456_v46 = vpop.permute.xlu2 %1227 }
 0x147   : > { %v653_v37 = vsel %vm434_vm5, %v652_v40, %v2561_v32  ;;  %v660_v27 = vsel %vm434_vm5, %v659_v15, %v2562_v26  ;;  %v4181_v32 = vunpack.i.h.bf16 %v3347_v23 }
 0x148   : > { %v654_v52 = vsel %vm436_vm6, %v653_v37, %v2531_v38  ;;  %v661_v0 = vsel %vm436_vm6, %v660_v27, %v2532_v50  ;;  %v4180_v50 = vunpack.i.l.bf16 %v3347_v23 }
 0x149   : > { %v655_v28 = vsel %vm438_vm7, %v654_v52, %v2566_v34  ;;  %v662_v16 = vsel %vm438_vm7, %v661_v0, %v2567_v11  ;;  %v2587_v11 = vunpack.i.h.bf16 %v3454_v25  ;;  %v2552_v34 = vunpack.i.h.bf16 %v3450_v18 }
 0x14a   : > { %v2580_v20 = vpop.permute.xlu0 %2579  ;;  %v656_v7 = vsel %vm440_vm8, %v655_v28, %v2536_v30  ;;  %v663_v35 = vsel %vm440_vm8, %v662_v16, %v2537_v47  ;;  %v2546_v47 = vunpack.i.l.bf16 %v3452_v1  ;;  %v4179_v16 = vunpack.i.h.bf16 %v3442_v54 }
 0x14b   : > { %v2582_v39 = vunpack.i.h.bf16 %v2580_v20  ;;  %v2581_v29 = vunpack.i.l.bf16 %v2580_v20  ;;  %v1801_v20 = vrot.slane %v4181_v32, 4 }
 0x14c   : > { %v2575_v9 = vpop.permute.xlu1 %2574 }
 0x14d   : > { %v2577_v56 = vunpack.i.h.bf16 %v2575_v9  ;;  %v2576_v5 = vunpack.i.l.bf16 %v2575_v9  ;;  %v4187_v9 = vunpack.i.h.bf16 %v3440_v57 }
 0x14e   : > { %v3462_v33 = vpop.permute.xlu2 %1239 }
 0x14f   : > { %v864_v58 = vsel %vm430_vm3, %v3309_v21, %v2577_v56  ;;  %v857_v62 = vsel %vm430_vm3, %v3305_v2, %v2576_v5  ;;  %v657_v21 = vsel %vm442_vm9, %v656_v7, %v2571_v63  ;;  %v664_v2 = vsel %vm442_vm9, %v663_v35, %v2572_v48 }
 0x150   : > { %v865_v40 = vsel %vm432_vm4, %v864_v58, %v2542_v3  ;;  %v858_v15 = vsel %vm432_vm4, %v857_v62, %v2541_v53  ;;  %v2123_v38 = vrot.slane %v657_v21, 4  ;;  %v2124_v37 = vrot.slane %v664_v2, 4 }
 0x151   : > { %v866_v51 = vsel %vm434_vm5, %v865_v40, %v2582_v39  ;;  %v859_v26 = vsel %vm434_vm5, %v858_v15, %v2581_v29  ;;  %v1745_v3 = vrot.slane %v4180_v50, 4  ;;  %v2547_v53 = vunpack.i.h.bf16 %v3452_v1 }
 0x152   : > { %v3482_v52 = vsel %vm2145_vm10, %v3142_v12, %v2123_v38  ;;  %v3486_v0 = vsel %vm2145_vm10, %v3145_v17, %v2124_v37  ;;  %v4186_v12 = vunpack.i.l.bf16 %v3440_v57  ;;  %v2586_v17 = vunpack.i.l.bf16 %v3454_v25 }
 0x153   : > { %4193 = vst [vmem:[#allocation2_spill] sm:$0xff] %v3482_v52  ;;  %v2551_v56 = vunpack.i.l.bf16 %v3450_v18  ;;  %v860_v48 = vsel %vm436_vm6, %v859_v26, %v2546_v47  ;;  %v867_v63 = vsel %vm436_vm6, %v866_v51, %v2547_v53  ;;  %v1802_v25 = vsel %vm262_vm0, %v1801_v20, %v4187_v9 }
 0x154   : > { %v2590_v27 = vpop.permute.xlu1 %2589  ;;  %4194 = vst [vmem:[#allocation3_spill] sm:$0xff] %v3486_v0  ;;  %v861_v29 = vsel %vm438_vm7, %v860_v48, %v2586_v17  ;;  %v868_v58 = vsel %vm438_vm7, %v867_v63, %v2587_v11  ;;  %v1746_v18 = vsel %vm262_vm0, %v1745_v3, %v4186_v12  ;;  %v4177_v40 = vunpack.i.l.bf16 %v3442_v54 }
 0x155   : > { %v2592_v1 = vunpack.i.h.bf16 %v2590_v27  ;;  %v2591_v39 = vunpack.i.l.bf16 %v2590_v27  ;;  %v862_v62 = vsel %vm440_vm8, %v861_v29, %v2551_v56  ;;  %v869_v28 = vsel %vm440_vm8, %v868_v58, %v2552_v34 }
 0x156   : > { %v3494_v30 = vpop.permute.xlu2 %1925  ;;  %v2129_v7 = vrot.slane %v3335_v45, 4  ;;  %v2130_v35 = vrot.slane %v3340_v19, 4  ;;  %v1808_v21 = vperm.slane %v1802_v25, %v2809_v10  ;;  %v1752_v2 = vperm.slane %v1746_v18, %v2809_v10 }
 0x157   : > { %v1244_v5 = vpop.permute.xlu0 %1243  ;;  %v863_v51 = vsel %vm442_vm9, %v862_v62, %v2591_v39  ;;  %v870_v26 = vsel %vm442_vm9, %v869_v28, %v2592_v1  ;;  %v1789_v45 = vrot.slane %v4179_v16, 4  ;;  %v1733_v19 = vrot.slane %v4177_v40, 4 }
 0x158   : > { %v3525_v37 = vsel %vm2145_vm10, %v863_v51, %v2129_v7  ;;  %v3528_v27 = vsel %vm2145_vm10, %v870_v26, %v2130_v35  ;;  %v1539_v47 = vrot.slane %v3054_v42, 4  ;;  %v1527_v34 = vrot.slane %v3089_v49, 4 }
 0x159   : > { %4195 = vst [vmem:[#allocation4_spill] sm:$0xff] %v3525_v37  ;;  %v1813_v63 = vrot.slane %v1808_v21, 4  ;;  %v1757_v1 = vrot.slane %v1752_v2, 4  ;;  %v1995_v9 = vrot.slane %v3494_v30, 4 }
 0x15a   : > { %4196 = vst [vmem:[#allocation5_spill] sm:$0xff] %v3528_v27  ;;  %v1540_v62 = vsel %vm262_vm0, %v1539_v47, %v3075_v43  ;;  %v1528_v7 = vsel %vm262_vm0, %v1527_v34, %v3418_v4 }
 0x15b   : > { %v1546_v47 = vperm.slane %v1540_v62, %v2809_v10 }
 0x15c   : > { %v1236_v15 = vpop.permute.xlu1 %1235 }
 0x15e   : > { %v3522_v38 = vpop.permute.xlu2 %2604 }
 0x15f   : > { %v4185_v20 = vunpack.i.h.bf16 %v3522_v38  ;;  %v4184_v3 = vunpack.i.l.bf16 %v3522_v38  ;;  %v1232_v53 = vpop.permute.xlu0 %1231  ;;  %v4203_v52 = vunpack.i.h.bf16 %v3522_v38  ;;  %v4204_v27 = vunpack.i.l.bf16 %v3522_v38 }
 0x161   : > { %v1790_v11 = vsel %vm262_vm0, %v1789_v45, %v4185_v20  ;;  %v1734_v17 = vsel %vm262_vm0, %v1733_v19, %v4184_v3 }
 0x162   : > { %v1796_v56 = vperm.slane %v1790_v11, %v2809_v10  ;;  %v1740_v48 = vperm.slane %v1734_v17, %v2809_v10 }
 0x164   : > { %v1815_v39 = vrot.slane %v1796_v56, 4  ;;  %v1759_v29 = vrot.slane %v1740_v48, 4  ;;  %v1224_v58 = vpop.permute.xlu1 %1223  ;;  %v1758_v25 = vsel %vm262_vm0, %v1757_v1, %v1740_v48  ;;  %v1814_v18 = vsel %vm262_vm0, %v1813_v63, %v1796_v56 }
 0x165   : > { %v1278_v28 = vsel %vm430_vm3, %v3379_v14, %v1224_v58  ;;  %v3563_v14 = vperm.slane %v1758_v25, %v2840_v31  ;;  %v1534_v56 = vperm.slane %v1528_v7, %v2809_v10  ;;  %v1551_v58 = vrot.slane %v1546_v47, 4 }
 0x166   : > { %v1279_v35 = vsel %vm432_vm4, %v1278_v28, %v3456_v46  ;;  %v1760_v51 = vsel %vm262_vm0, %v1752_v2, %v1759_v29  ;;  %v1816_v19 = vsel %vm262_vm0, %v1808_v21, %v1815_v39  ;;  %v3572_v46 = vperm.slane %v1814_v18, %v2840_v31 }
 0x167   : > { %v1280_v26 = vsel %vm434_vm5, %v1279_v35, %v1232_v53  ;;  %v3559_v45 = vperm.slane %v1760_v51, %v2840_v31  ;;  %v3566_v11 = vpop.permute.xlu0 %1921  ;;  %v3569_v17 = vperm.slane %v1816_v19, %v2840_v31  ;;  %v1595_v53 = vrot.slane %v3057_v41, 4 }
 0x168   : > { %v1281_v2 = vsel %vm436_vm6, %v1280_v26, %v1236_v15  ;;  %v1781_v34 = vrot.slane %v3563_v14, 4  ;;  %v1837_v63 = vrot.slane %v3572_v46, 4  ;;  %v1583_v25 = vrot.slane %v3092_v55, 4 }
 0x169   : > { %v1282_v21 = vsel %vm438_vm7, %v1281_v2, %v3462_v33  ;;  %v2618_v48 = vpack.i.bf16 %v3569_v17, %v3559_v45  ;;  %v1596_v28 = vsel %vm262_vm0, %v1595_v53, %v3078_v44  ;;  %v1552_v18 = vsel %vm262_vm0, %v1551_v58, %v1534_v56 }
 0x16a   : > { %v1283_v1 = vsel %vm440_vm8, %v1282_v21, %v1244_v5  ;;  %v1782_v39 = vsel %vm262_vm0, 0.0, %v1781_v34  ;;  %v1838_v15 = vsel %vm262_vm0, 0.0, %v1837_v63  ;;  %v1602_v7 = vperm.slane %v1596_v28, %v2809_v10 }
 0x16b   : > { %2619 = vrot.lane.b32.xlu1 %v2618_v48, %s2733_s26  ;;  %v2613_v62 = vpack.i.bf16 %v1838_v15, %v1782_v39  ;;  %v1584_v35 = vsel %vm262_vm0, %v1583_v25, %v3421_v36  ;;  %v4175_v51 = vunpack.i.h.bf16 %v3371_v8  ;;  %v4174_v26 = vunpack.i.l.bf16 %v3371_v8 }
 0x16c   : > { %v1248_v29 = vpop.permute.xlu1 %1247  ;;  %v1590_v2 = vperm.slane %v1584_v35, %v2809_v10  ;;  %v1607_v34 = vrot.slane %v1602_v7, 4  ;;  %v3608_v21 = vperm.slane %v3408_v61, %v2809_v10 }
 0x16d   : > { %v3588_v33 = vsel %vm442_vm9, %v1283_v1, %v1248_v29  ;;  %2614 = vrot.lane.b32.xlu0 %v2613_v62, %s2735_s28  ;;  %v1384_v48 = vrot.slane %v4175_v51, 4  ;;  %v1328_v39 = vrot.slane %v4174_v26, 4  ;;  %v2007_v29 = vrot.slane %v3438_v6, 4 }
 0x16e   : > { %4197 = vst [vmem:[#allocation6_spill] sm:$0xff] %v3588_v33  ;;  %v1608_v62 = vsel %vm262_vm0, %v1607_v34, %v1590_v2  ;;  %v1963_v28 = vrot.slane %v3608_v21, 4  ;;  %v3635_v51 = vperm.slane %v1552_v18, %v2840_v31 }
 0x16f   : > { %v3595_v5 = vpop.permute.xlu0 %2594  ;;  %v2008_v35 = vsel %vm262_vm0, %v2007_v29, %v3566_v11  ;;  %v1553_v29 = vrot.slane %v1534_v56, 4 }
 0x170   : > { %v4176_v53 = vunpack.i.h.bf16 %v3595_v5  ;;  %v4178_v63 = vunpack.i.l.bf16 %v3595_v5  ;;  %v2014_v32 = vperm.slane %v2008_v35, %v2809_v10 }
 0x171   : > { %v1554_v16 = vsel %vm262_vm0, %v1546_v47, %v1553_v29 }
 0x172   : > { %v1385_v58 = vsel %vm262_vm0, %v1384_v48, %v4176_v53  ;;  %v1329_v26 = vsel %vm262_vm0, %v1328_v39, %v4178_v63  ;;  %v3647_v53 = vperm.slane %v1608_v62, %v2840_v31  ;;  %v3684_v12 = vperm.slane %v1554_v16, %v2840_v31 }
 0x173   : > { %v3638_v48 = vperm.slane %v1385_v58, %v2809_v10  ;;  %v1609_v58 = vrot.slane %v1590_v2, 4  ;;  %v3655_v63 = vperm.slane %v1329_v26, %v2809_v10  ;;  %v1575_v2 = vrot.slane %v3635_v51, 4 }
 0x174   : > { %v3602_v19 = vpop.permute.xlu1 %1923  ;;  %v1631_v26 = vrot.slane %v3647_v53, 4  ;;  %v2019_v0 = vrot.slane %v2014_v32, 4 }
 0x175   : > { %v1939_v1 = vrot.slane %v3602_v19, 4  ;;  %v1396_v47 = vrot.slane %v3638_v48, 4  ;;  %v1340_v35 = vrot.slane %v3655_v63, 4 }
 0x177   : > { %v3616_v15 = vpop.permute.xlu0 %1915 }
 0x178   : > { %v1940_v61 = vsel %vm262_vm0, %v1939_v1, %v3616_v15  ;;  %v3640_v1 = vpop.permute.xlu2 %2609 }
 0x179   : > { %v3627_v25 = vperm.slane %v1940_v61, %v2809_v10  ;;  %v4189_v50 = vunpack.i.h.bf16 %v3640_v1 }
 0x17b   : > { %v1964_v61 = vsel %vm262_vm0, %v1963_v28, %v3627_v25  ;;  %v4188_v28 = vunpack.i.l.bf16 %v3640_v1 }
 0x17c   : > { %v3642_v34 = vpop.permute.xlu1 %2599  ;;  %v3652_v18 = vperm.slane %v1964_v61, %v2840_v31 }
 0x17d   : > { %v4182_v40 = vunpack.i.h.bf16 %v3642_v34  ;;  %v4183_v39 = vunpack.i.l.bf16 %v3642_v34 }
 0x17e   : > { %4198 = vst [vmem:[#allocation7_spill] sm:$0xff] %v3652_v18  ;;  %v1987_v61 = vrot.slane %v3652_v18, 4 }
 0x17f   : > { %v1372_v56 = vrot.slane %v4182_v40, 4  ;;  %v1316_v62 = vrot.slane %v4183_v39, 4  ;;  %v1610_v39 = vsel %vm262_vm0, %v1602_v7, %v1609_v58  ;;  %v4199_v7 = vunpack.i.h.bf16 %v3440_v57 }
 0x181   : > { %v1317_v29 = vsel %vm262_vm0, %v1316_v62, %v4188_v28  ;;  %v1373_v40 = vsel %vm262_vm0, %v1372_v56, %v4189_v50  ;;  %v1988_v62 = vsel %vm262_vm0, 0.0, %v1987_v61  ;;  %v3689_v28 = vperm.slane %v1610_v39, %v2840_v31 }
 0x182   : > { %v3678_v3 = vperm.slane %v1317_v29, %v2809_v10  ;;  %v3681_v20 = vperm.slane %v1373_v40, %v2809_v10  ;;  %v1803_v58 = vrot.slane %v4199_v7, 4  ;;  %2052 = vrot.lane.b32.xlu2 %v1988_v62, %s2735_s28  ;;  %v1576_v40 = vsel %vm262_vm0, 0.0, %v1575_v2 }
 0x183   : > { %v1632_v39 = vsel %vm262_vm0, 0.0, %v1631_v26  ;;  %v4202_v7 = vunpack.i.l.bf16 %v3440_v57 }
 0x184   : > { %v3694_v56 = vpop.permute.xlu1 %1917  ;;  %v1341_v16 = vsel %vm262_vm0, %v1340_v35, %v3678_v3  ;;  %v1397_v29 = vsel %vm262_vm0, %v1396_v47, %v3681_v20  ;;  %v2643_v47 = vpack.i.bf16 %v3689_v28, %v3684_v12  ;;  %v2628_v37 = vpack.i.bf16 %v1632_v39, %v1576_v40 }
 0x185   : > { %v1996_v61 = vsel %vm262_vm0, %v1995_v9, %v3694_v56  ;;  %v3705_v50 = vperm.slane %v1341_v16, %v2840_v31  ;;  %v3708_v62 = vperm.slane %v1397_v29, %v2840_v31  ;;  %v1747_v2 = vrot.slane %v4202_v7, 4 }
 0x186   : > { %v2002_v35 = vperm.slane %v1996_v61, %v2809_v10  ;;  %v1791_v9 = vrot.slane %v4203_v52, 4  ;;  %v1735_v29 = vrot.slane %v4204_v27, 4  ;;  %v4205_v7 = vunpack.i.h.bf16 %v3347_v23 }
 0x187   : > { %4200 = vst [vmem:[#allocation8_spill] sm:$0xff] %v3705_v50  ;;  %v1364_v26 = vrot.slane %v3705_v50, 4  ;;  %v1420_v16 = vrot.slane %v3708_v62, 4  ;;  %v4206_v50 = vunpack.i.l.bf16 %v3347_v23  ;;  %v4207_v27 = vunpack.i.h.bf16 %v3442_v54 }
 0x188   : > { %4201 = vst [vmem:[#allocation9_spill] sm:$0xff] %v3708_v62  ;;  %v2020_v57 = vsel %vm262_vm0, %v2019_v0, %v2002_v35  ;;  %v1804_v61 = vsel %vm262_vm0, %v4205_v7, %v1803_v58  ;;  %v1965_v40 = vrot.slane %v3627_v25, 4  ;;  %v2021_v39 = vrot.slane %v2002_v35, 4 }
 0x189   : > { %v1365_v33 = vsel %vm262_vm0, 0.0, %v1364_v26  ;;  %v1421_v18 = vsel %vm262_vm0, 0.0, %v1420_v16  ;;  %v3728_v52 = vperm.slane %v2020_v57, %v2840_v31  ;;  %v1748_v62 = vsel %vm262_vm0, %v4206_v50, %v1747_v2 }
 0x18a   : > { %v2623_v38 = vpack.i.bf16 %v1421_v18, %v1365_v33  ;;  %v1792_v0 = vsel %vm262_vm0, %v4207_v27, %v1791_v9  ;;  %v3739_v26 = vperm.slane %v1804_v61, %v2809_v10  ;;  %v4208_v16 = vunpack.i.l.bf16 %v3442_v54  ;;  %2629 = vrot.lane.b32.xlu2 %v2628_v37, %s2735_s28 }
 0x18b   : > { %v2043_v58 = vrot.slane %v3728_v52, 4  ;;  %v1577_v23 = vrot.slane %v3684_v12, 4  ;;  %v1633_v50 = vrot.slane %v3689_v28, 4  ;;  %v3749_v33 = vperm.slane %v1748_v62, %v2809_v10 }
 0x18c   : > { %v1736_v57 = vsel %vm262_vm0, %v4208_v16, %v1735_v29  ;;  %2624 = vrot.lane.b32.xlu1 %v2623_v38, %s2735_s28  ;;  %v1783_v18 = vrot.slane %v3559_v45, 4  ;;  %v1839_v2 = vrot.slane %v3569_v17, 4  ;;  %v3755_v54 = vperm.slane %v1792_v0, %v2809_v10 }
 0x18d   : > { %v2044_v25 = vsel %vm262_vm0, 0.0, %v2043_v58  ;;  %v3759_v37 = vsel %vm262_vm0, 0.0, %v1577_v23  ;;  %v3762_v12 = vsel %vm262_vm0, 0.0, %v1633_v50  ;;  %v3765_v28 = vperm.slane %v1736_v57, %v2809_v10 }
 0x18e   : > { %2080 = vrot.lane.b32.xlu0 %v2044_v25, %s2735_s28  ;;  %v2022_v62 = vsel %vm262_vm0, %v2014_v32, %v2021_v39  ;;  %v1966_v45 = vsel %vm262_vm0, %v3608_v21, %v1965_v40  ;;  %v2658_v17 = vpack.i.bf16 %v3762_v12, %v3759_v37  ;;  %v1342_v35 = vrot.slane %v3678_v3, 4 }
 0x18f   : > { %v1398_v9 = vrot.slane %v3681_v20, 4  ;;  %v1825_v29 = vrot.slane %v3739_v26, 4  ;;  %v1769_v7 = vrot.slane %v3749_v33, 4  ;;  %v1784_v61 = vsel %vm262_vm0, 0.0, %v1783_v18 }
 0x190   : > { %v1840_v38 = vsel %vm262_vm0, 0.0, %v1839_v2  ;;  %v2030_v32 = vperm.slane %v2022_v62, %v2840_v31  ;;  %v1974_v27 = vperm.slane %v1966_v45, %v2840_v31  ;;  %v1343_v0 = vsel %vm262_vm0, %v3655_v63, %v1342_v35 }
 0x191   : > { %v1770_v21 = vsel %vm262_vm0, %v1769_v7, %v3765_v28  ;;  %v1826_v3 = vsel %vm262_vm0, %v1825_v29, %v3755_v54  ;;  %v2633_v20 = vpack.i.bf16 %v1840_v38, %v1784_v61  ;;  %v1399_v40 = vsel %vm262_vm0, %v3638_v48, %v1398_v9 }
 0x192   : > { %2084 = vrot.lane.b32.xlu2 %v2030_v32, %s2733_s26  ;;  %v1776_v39 = vperm.slane %v1770_v21, %v2840_v31  ;;  %v1832_v58 = vperm.slane %v1826_v3, %v2840_v31  ;;  %v1351_v16 = vperm.slane %v1343_v0, %v2840_v31  ;;  %v1407_v57 = vperm.slane %v1399_v40, %v2840_v31 }
 0x193   : > { %v1541_v23 = vrot.slane %v3075_v43, 4  ;;  %v1585_v50 = vrot.slane %v3421_v36, 4  ;;  %v1529_v25 = vrot.slane %v3418_v4, 4  ;;  %v1597_v63 = vrot.slane %v3078_v44, 4 }
 0x194   : > { %2056 = vrot.lane.b32.xlu1 %v1974_v27, %s2733_s26  ;;  %v2648_v18 = vpack.i.bf16 %v1832_v58, %v1776_v39  ;;  %v3801_v48 = vperm.slane %v3384_v24, %v2840_v31  ;;  %v2638_v2 = vpack.i.bf16 %v1407_v57, %v1351_v16  ;;  %v1989_v9 = vrot.slane %v1974_v27, 4 }
 0x195   : > { %v1530_v62 = vsel %vm262_vm0, %v3089_v49, %v1529_v25  ;;  %v1542_v43 = vsel %vm262_vm0, %v3054_v42, %v1541_v23  ;;  %v1586_v4 = vsel %vm262_vm0, %v3092_v55, %v1585_v50  ;;  %v1598_v36 = vsel %vm262_vm0, %v3057_v41, %v1597_v63 }
 0x196   : > { %2634 = vrot.lane.b32.xlu0 %v2633_v20, %s2734_s27  ;;  %v3812_v44 = vperm.slane %v1530_v62, %v2809_v10  ;;  %v3815_v24 = vperm.slane %v1542_v43, %v2809_v10  ;;  %v3822_v49 = vperm.slane %v1586_v4, %v2809_v10  ;;  %v3825_v42 = vperm.slane %v1598_v36, %v2809_v10 }
 0x197   : > { %v2045_v55 = vrot.slane %v2030_v32, 4  ;;  %v2009_v41 = vrot.slane %v3566_v11, 4  ;;  %v1785_v21 = vrot.slane %v1776_v39, 4  ;;  %v1841_v3 = vrot.slane %v1832_v58, 4 }
 0x198   : > { %v1563_v45 = vrot.slane %v3815_v24, 4  ;;  %v1619_v35 = vrot.slane %v3825_v42, 4  ;;  %v1997_v27 = vrot.slane %v3694_v56, 4  ;;  %v1990_v11 = vsel %vm262_vm0, 0.0, %v1989_v9 }
 0x199   : > { %v2046_v32 = vsel %vm262_vm0, 0.0, %v2045_v55  ;;  %v1366_v0 = vrot.slane %v1351_v16, 4  ;;  %v1422_v40 = vrot.slane %v1407_v57, 4  ;;  %v2010_v39 = vsel %vm262_vm0, %v3438_v6, %v2009_v41 }
 0x19a   : > { %2649 = vrot.lane.b32.xlu2 %v2648_v18, %s2732_s25  ;;  %v1564_v29 = vsel %vm262_vm0, %v1563_v45, %v3812_v44  ;;  %v1620_v38 = vsel %vm262_vm0, %v1619_v35, %v3822_v49  ;;  %v1941_v58 = vrot.slane %v3616_v15, 4  ;;  %v3854_v56 = vperm.slane %v3403_v22, %v2809_v10 }
 0x19b   : > { %v3834_v61 = vperm.slane %v1564_v29, %v2840_v31  ;;  %v3840_v20 = vperm.slane %v1620_v38, %v2840_v31  ;;  %v4209_v50 = vunpack.i.h.bf16 %v3595_v5  ;;  %v1786_v16 = vsel %vm262_vm0, 0.0, %v1785_v21 }
 0x19c   : > { %2644 = vrot.lane.b32.xlu1 %v2643_v47, %s2733_s26  ;;  %v1214_v47 = vrot.slane %v3801_v48, 4  ;;  %v1842_v57 = vsel %vm262_vm0, 0.0, %v1841_v3  ;;  %v4210_v63 = vunpack.i.l.bf16 %v3595_v5  ;;  %v1998_v6 = vsel %vm262_vm0, %v3494_v30, %v1997_v27 }
 0x19d   : > { %v2673_v23 = vpack.i.bf16 %v3840_v20, %v3834_v61  ;;  %v1386_v25 = vrot.slane %v4209_v50, 4  ;;  %v3865_v15 = vperm.slane %v2010_v39, %v2809_v10  ;;  %v1423_v22 = vsel %vm262_vm0, 0.0, %v1422_v40 }
 0x19e   : > { %2639 = vrot.lane.b32.xlu0 %v2638_v2, %s2733_s26  ;;  %v1215_v7 = vsel %vm262_vm0, 0.0, %v1214_v47  ;;  %v1330_v18 = vrot.slane %v4210_v63, 4  ;;  %v1367_v2 = vsel %vm262_vm0, 0.0, %v1366_v0  ;;  %v1942_v62 = vsel %vm262_vm0, %v3602_v19, %v1941_v58 }
 0x19f   : > { %v4211_v43 = vunpack.i.h.bf16 %v3640_v1  ;;  %v4212_v36 = vunpack.i.l.bf16 %v3640_v1  ;;  %v2663_v47 = vpack.i.bf16 %v1842_v57, %v1786_v16  ;;  %v1975_v55 = vrot.slane %v3854_v56, 4 }
 0x1a0   : > { %v4213_v30 = vunpack.i.h.bf16 %v3371_v8  ;;  %v3880_v35 = vperm.slane %v1998_v6, %v2809_v10  ;;  %v4214_v9 = vunpack.i.l.bf16 %v3371_v8  ;;  %v2653_v1 = vpack.i.bf16 %v1423_v22, %v1367_v2 }
 0x1a1   : > { %v1374_v4 = vrot.slane %v4211_v43, 4  ;;  %v1318_v5 = vrot.slane %v4212_v36, 4  ;;  %v1579_v29 = vrot.slane %v3834_v61, 4  ;;  %v1635_v41 = vrot.slane %v3840_v20, 4 }
 0x1a2   : > { %1251 = vrot.lane.b32.xlu2 %v1215_v7, %s2735_s28  ;;  %v1387_v45 = vsel %vm262_vm0, %v4213_v30, %v1386_v25  ;;  %v1331_v19 = vsel %vm262_vm0, %v4214_v9, %v1330_v18  ;;  %v1827_v7 = vrot.slane %v3755_v54, 4  ;;  %v1771_v38 = vrot.slane %v3765_v28, 4 }
 0x1a3   : > { %v2031_v8 = vrot.slane %v3865_v15, 4  ;;  %v4215_v21 = vunpack.i.l.bf16 %v3642_v34  ;;  %v4216_v37 = vunpack.i.h.bf16 %v3642_v34  ;;  %v1636_v54 = vsel %vm262_vm0, 0.0, %v1635_v41 }
 0x1a4   : > { %2088 = vrot.lane.b32.xlu1 %v2046_v32, %s2734_s27  ;;  %v3896_v32 = vperm.slane %v1942_v62, %v2809_v10  ;;  %v3908_v28 = vperm.slane %v1387_v45, %v2809_v10  ;;  %v3911_v61 = vperm.slane %v1331_v19, %v2809_v10  ;;  %v1201_v40 = vperm.slane %v3387_v13, %v2840_v31 }
 0x1a5   : > { %v1319_v3 = vsel %vm262_vm0, %v4215_v21, %v1318_v5  ;;  %v1375_v12 = vsel %vm262_vm0, %v4216_v37, %v1374_v4  ;;  %v2032_v20 = vsel %vm262_vm0, %v2031_v8, %v3880_v35  ;;  %v1772_v25 = vsel %vm262_vm0, %v3749_v33, %v1771_v38 }
 0x1a6   : > { %2060 = vrot.lane.b32.xlu0 %v1990_v11, %s2734_s27  ;;  %v3916_v34 = vperm.slane %v1319_v3, %v2809_v10  ;;  %v3919_v11 = vperm.slane %v1375_v12, %v2809_v10  ;;  %v1976_v0 = vsel %vm262_vm0, %v1975_v55, %v3896_v32  ;;  %v2038_v39 = vperm.slane %v2032_v20, %v2840_v31 }
 0x1a7   : > { %v1408_v58 = vrot.slane %v3908_v28, 4  ;;  %v1352_v50 = vrot.slane %v3911_v61, 4  ;;  %v1828_v16 = vsel %vm262_vm0, %v3739_v26, %v1827_v7  ;;  %v1982_v10 = vperm.slane %v1976_v0, %v2840_v31 }
 0x1a8   : > { %v1780_v63 = vperm.slane %v1772_v25, %v2840_v31  ;;  %v1836_v33 = vperm.slane %v1828_v16, %v2840_v31  ;;  %v1216_v22 = vrot.slane %v1201_v40, 4  ;;  %v2047_v62 = vrot.slane %v2038_v39, 4 }
 0x1a9   : > { %v1353_v13 = vsel %vm262_vm0, %v1352_v50, %v3916_v34  ;;  %v1409_v57 = vsel %vm262_vm0, %v1408_v58, %v3919_v11  ;;  %v1565_v43 = vrot.slane %v3812_v44, 4  ;;  %v1621_v4 = vrot.slane %v3822_v49, 4 }
 0x1aa   : > { %2664 = vrot.lane.b32.xlu2 %v2663_v47, %s2738_s6  ;;  %v1359_v26 = vperm.slane %v1353_v13, %v2840_v31  ;;  %v1415_v18 = vperm.slane %v1409_v57, %v2840_v31  ;;  %v2678_v6 = vpack.i.bf16 %v1836_v33, %v1780_v63  ;;  %v1991_v36 = vrot.slane %v1982_v10, 4 }
 0x1ab   : > { %v1566_v5 = vsel %vm262_vm0, %v3815_v24, %v1565_v43  ;;  %v1622_v47 = vsel %vm262_vm0, %v3825_v42, %v1621_v4  ;;  %v1217_v30 = vsel %vm262_vm0, 0.0, %v1216_v22  ;;  %v2048_v45 = vsel %vm262_vm0, 0.0, %v2047_v62 }
 0x1ac   : > { %2659 = vrot.lane.b32.xlu1 %v2658_v17, %s2734_s27  ;;  %v1580_v17 = vsel %vm262_vm0, 0.0, %v1579_v29  ;;  %v2668_v2 = vpack.i.bf16 %v1415_v18, %v1359_v26  ;;  %v1574_v55 = vperm.slane %v1566_v5, %v2840_v31  ;;  %v1787_v9 = vrot.slane %v1780_v63, 4 }
 0x1ad   : > { %v2688_v27 = vpack.i.bf16 %v1636_v54, %v1580_v17  ;;  %v1843_v19 = vrot.slane %v1836_v33, 4  ;;  %v1992_v24 = vsel %vm262_vm0, 0.0, %v1991_v36  ;;  %v1368_v49 = vrot.slane %v1359_v26, 4 }
 0x1ae   : > { %2654 = vrot.lane.b32.xlu0 %v2653_v1, %s2734_s27  ;;  %v1424_v1 = vrot.slane %v1415_v18, 4  ;;  %v1788_v42 = vsel %vm262_vm0, 0.0, %v1787_v9  ;;  %v2033_v8 = vrot.slane %v3880_v35, 4  ;;  %v1977_v21 = vrot.slane %v3896_v32, 4 }
 0x1af   : > { %v1844_v29 = vsel %vm262_vm0, 0.0, %v1843_v19  ;;  %v1369_v41 = vsel %vm262_vm0, 0.0, %v1368_v49  ;;  %v1581_v37 = vrot.slane %v1574_v55, 4  ;;  %v1354_v17 = vrot.slane %v3916_v34, 4 }
 0x1b0   : > { %v1425_v7 = vsel %vm262_vm0, 0.0, %v1424_v1  ;;  %v2693_v38 = vpack.i.bf16 %v1844_v29, %v1788_v42  ;;  %v2034_v54 = vsel %vm262_vm0, %v3865_v15, %v2033_v8  ;;  %v1410_v20 = vrot.slane %v3919_v11, 4 }
 0x1b1   : > { %v2683_v3 = vpack.i.bf16 %v1425_v7, %v1369_v41  ;;  %v1978_v35 = vsel %vm262_vm0, %v3854_v56, %v1977_v21  ;;  %v1582_v32 = vsel %vm262_vm0, 0.0, %v1581_v37  ;;  %v1355_v15 = vsel %vm262_vm0, %v3911_v61, %v1354_v17 }
 0x1b2   : > { %1255 = vrot.lane.b32.xlu2 %v1201_v40, %s2733_s26  ;;  %v1209_v40 = vperm.slane %v3390_v59, %v2840_v31  ;;  %v1986_v34 = vperm.slane %v1978_v35, %v2840_v31  ;;  %v1411_v56 = vsel %vm262_vm0, %v3908_v28, %v1410_v20  ;;  %v1363_v58 = vperm.slane %v1355_v15, %v2840_v31  ;;  %s245_s26 = scalar_lea.vmem %s4173_s5, %s2344_s20 }
 0x1b3   : > { %v1419_v59 = vperm.slane %v1411_v56, %v2840_v31  ;;  %v1213_v62 = vperm.slane %v3396_v60, %v2840_v31 }
 0x1b4   : > { %2092 = vrot.lane.b32.xlu1 %v2038_v39, %s2732_s25  ;;  %v2042_v39 = vperm.slane %v2034_v54, %v2840_v31  ;;  %v1993_v11 = vrot.slane %v1986_v34, 4  ;;  %v1370_v25 = vrot.slane %v1363_v58, 4  ;;  %v1218_v57 = vrot.slane %v1209_v40, 4 }
 0x1b5   : > { %v1426_v16 = vrot.slane %v1419_v59, 4  ;;  %v1220_v60 = vrot.slane %v1213_v62, 4 }
 0x1b6   : > { %2064 = vrot.lane.b32.xlu0 %v1982_v10, %s2732_s25  ;;  %v1994_v50 = vsel %vm262_vm0, 0.0, %v1993_v11  ;;  %v2698_v10 = vpack.i.bf16 %v1419_v59, %v1363_v58  ;;  %v1371_v28 = vsel %vm262_vm0, 0.0, %v1370_v25  ;;  %v2049_v26 = vrot.slane %v2042_v39, 4  ;;  %v4217_v25 = vld [vmem:[#allocation9_spill] sm:$0xff] }
 0x1b7   : > { %v1427_v13 = vsel %vm262_vm0, 0.0, %v1426_v16  ;;  %v1219_v22 = vsel %vm262_vm0, 0.0, %v1218_v57 }
 0x1ba   : > { %2679 = vrot.lane.b32.xlu2 %v2678_v6, %s2736_s29 }
 0x1bc   : > { %2674 = vrot.lane.b32.xlu1 %v2673_v23, %s2732_s25  ;;  %v1630_v23 = vperm.slane %v1622_v47, %v2840_v31  ;;  %v2050_v47 = vsel %vm262_vm0, 0.0, %v2049_v26 }
 0x1be   : > { %2669 = vrot.lane.b32.xlu0 %v2668_v2, %s2732_s25  ;;  %v2703_v44 = vpack.i.bf16 %v1630_v23, %v1574_v55  ;;  %v1637_v12 = vrot.slane %v1630_v23, 4  ;;  %v2708_v2 = vpack.i.bf16 %v1427_v13, %v1371_v28 }
 0x1c0   : > { %v1638_v0 = vsel %vm262_vm0, 0.0, %v1637_v12 }
 0x1c2   : > { %1259 = vrot.lane.b32.xlu2 %v1217_v30, %s2734_s27  ;;  %v1221_v30 = vsel %vm262_vm0, 0.0, %v1220_v60 }
 0x1c4   : > { %2096 = vrot.lane.b32.xlu1 %v2048_v45, %s2738_s6 }
 0x1c6   : > { %2068 = vrot.lane.b32.xlu0 %v1992_v24, %s2738_s6 }
 0x1ca   : > { %2694 = vrot.lane.b32.xlu2 %v2693_v38, %s2737_s30 }
 0x1cc   : > { %2689 = vrot.lane.b32.xlu1 %v2688_v27, %s2738_s6  ;;  %v2713_v27 = vpack.i.bf16 %v1638_v0, %v1582_v32 }
 0x1ce   : > { %2684 = vrot.lane.b32.xlu0 %v2683_v3, %s2738_s6 }
 0x1d2   : > { %1263 = vrot.lane.b32.xlu2 %v1209_v40, %s2732_s25 }
 0x1d4   : > { %2100 = vrot.lane.b32.xlu1 %v2042_v39, %s2736_s29 }
 0x1d6   : > { %2072 = vrot.lane.b32.xlu0 %v1986_v34, %s2736_s29 }
 0x1da   : > { %2076 = vrot.lane.b32.xlu2 %v1994_v50, %s2737_s30 }
 0x1dc   : > { %2704 = vrot.lane.b32.xlu1 %v2703_v44, %s2736_s29  ;;  %v3994_v61 = vpop.permute.xlu2 %2052 }
 0x1dd   : > { %v2620_v63 = vpop.permute.xlu1 %2619 }
 0x1de   : > { %2699 = vrot.lane.b32.xlu0 %v2698_v10, %s2736_s29  ;;  %v2622_v43 = vunpack.i.h.bf16 %v2620_v63  ;;  %v2621_v4 = vunpack.i.l.bf16 %v2620_v63  ;;  %v4218_v10 = vld [vmem:[#allocation8_spill] sm:$0xff] }
 0x1df   : > { %v2615_v33 = vpop.permute.xlu0 %2614 }
 0x1e0   : > { %v2617_v18 = vunpack.i.h.bf16 %v2615_v33  ;;  %v2616_v6 = vunpack.i.l.bf16 %v2615_v33 }
 0x1e2   : > { %v1908_v36 = vsel %vm430_vm3, %v3572_v46, %v2617_v18  ;;  %v1901_v5 = vsel %vm430_vm3, %v3563_v14, %v2616_v6  ;;  %2709 = vrot.lane.b32.xlu2 %v2708_v2, %s2737_s30 }
 0x1e3   : > { %v1902_v23 = vsel %vm432_vm4, %v1901_v5, %v2621_v4  ;;  %v1909_v31 = vsel %vm432_vm4, %v1908_v36, %v2622_v43 }
 0x1e4   : > { %1267 = vrot.lane.b32.xlu1 %v1219_v22, %s2738_s6  ;;  %v2630_v55 = vpop.permute.xlu2 %2629 }
 0x1e5   : > { %v2632_v12 = vunpack.i.h.bf16 %v2630_v55  ;;  %v2631_v17 = vunpack.i.l.bf16 %v2630_v55 }
 0x1e6   : > { %2104 = vrot.lane.b32.xlu0 %v2050_v47, %s2737_s30 }
 0x1e7   : > { %v1702_v34 = vsel %vm430_vm3, %v3647_v53, %v2632_v12  ;;  %v1695_v15 = vsel %vm430_vm3, %v3635_v51, %v2631_v17 }
 0x1ea   : > { %1275 = vrot.lane.b32.xlu2 %v1221_v30, %s2737_s30 }
 0x1ec   : > { %1271 = vrot.lane.b32.xlu1 %v1213_v62, %s2736_s29  ;;  %v2085_v14 = vpop.permute.xlu2 %2084 }
 0x1ee   : > { %2714 = vrot.lane.b32.xlu0 %v2713_v27, %s2737_s30 }
 0x1f4   : > { %v2650_v46 = vpop.permute.xlu2 %2649 }
 0x1f5   : > { %v2652_v7 = vunpack.i.h.bf16 %v2650_v46  ;;  %v2651_v38 = vunpack.i.l.bf16 %v2650_v46 }
 0x1fc   : > { %v4016_v45 = vpop.permute.xlu2 %1251 }
 0x1fe   : > { %v2625_v9 = vpop.permute.xlu1 %2624 }
 0x1ff   : > { %v2627_v32 = vunpack.i.h.bf16 %v2625_v9  ;;  %v2626_v0 = vunpack.i.l.bf16 %v2625_v9 }
 0x200   : > { %v2081_v19 = vpop.permute.xlu0 %2080 }
 0x201   : > { %v2114_v44 = vsel %vm430_vm3, %v3728_v52, %v2081_v19  ;;  %v1491_v16 = vsel %vm430_vm3, %v4217_v25, %v2627_v32  ;;  %v1484_v28 = vsel %vm430_vm3, %v4218_v10, %v2626_v0 }
 0x202   : > { %v4021_v24 = vsel %vm432_vm4, %v2114_v44, %v2085_v14 }
 0x204   : > { %v2665_v1 = vpop.permute.xlu2 %2664 }
 0x205   : > { %v2667_v8 = vunpack.i.h.bf16 %v2665_v1  ;;  %v2666_v21 = vunpack.i.l.bf16 %v2665_v1 }
 0x206   : > { %v2057_v49 = vpop.permute.xlu1 %2056 }
 0x208   : > { %v2635_v42 = vpop.permute.xlu0 %2634 }
 0x209   : > { %v2637_v29 = vunpack.i.h.bf16 %v2635_v42  ;;  %v2636_v41 = vunpack.i.l.bf16 %v2635_v42 }
 0x20b   : > { %v1903_v3 = vsel %vm434_vm5, %v1902_v23, %v2636_v41  ;;  %v1910_v37 = vsel %vm434_vm5, %v1909_v31, %v2637_v29  ;;  %v4219_v31 = vld [vmem:[#allocation7_spill] sm:$0xff] }
 0x20c   : > { %v1904_v52 = vsel %vm436_vm6, %v1903_v3, %v2651_v38  ;;  %v1911_v54 = vsel %vm436_vm6, %v1910_v37, %v2652_v7  ;;  %v4047_v13 = vpop.permute.xlu2 %1255  ;;  %v2107_v60 = vsel %vm430_vm3, %v4219_v31, %v3994_v61 }
 0x20d   : > { %v4028_v20 = vsel %vm438_vm7, %v1904_v52, %v2666_v21  ;;  %v4031_v35 = vsel %vm438_vm7, %v1911_v54, %v2667_v8  ;;  %v2108_v30 = vsel %vm432_vm4, %v2107_v60, %v2057_v49 }
 0x20e   : > { %v2645_v27 = vpop.permute.xlu1 %2644 }
 0x20f   : > { %v2647_v40 = vunpack.i.h.bf16 %v2645_v27  ;;  %v2646_v39 = vunpack.i.l.bf16 %v2645_v27 }
 0x210   : > { %v2640_v56 = vpop.permute.xlu0 %2639 }
 0x211   : > { %v4038_v11 = vsel %vm432_vm4, %v1702_v34, %v2647_v40  ;;  %v4041_v58 = vsel %vm432_vm4, %v1695_v15, %v2646_v39  ;;  %v2642_v59 = vunpack.i.h.bf16 %v2640_v56  ;;  %v2641_v50 = vunpack.i.l.bf16 %v2640_v56 }
 0x213   : > { %v1492_v53 = vsel %vm432_vm4, %v1491_v16, %v2642_v59  ;;  %v1485_v51 = vsel %vm432_vm4, %v1484_v28, %v2641_v50  ;;  %v4220_v28 = vld [vmem:[#allocation6_spill] sm:$0xff] }
 0x214   : > { %v4051_v33 = vpop.permute.xlu2 %2679 }
 0x215   : > { %v2682_v15 = vunpack.i.h.bf16 %v4051_v33  ;;  %v2681_v25 = vunpack.i.l.bf16 %v4051_v33 }
 0x216   : > { %v2089_v57 = vpop.permute.xlu1 %2088 }
 0x217   : > { %v2116_v40 = vsel %vm434_vm5, %v4021_v24, %v2089_v57  ;;  %v1285_v24 = vsel %vm430_vm3, %v3801_v48, %v4016_v45  ;;  %v1906_v48 = vsel %vm440_vm8, %v4028_v20, %v2681_v25  ;;  %v1913_v45 = vsel %vm440_vm8, %v4031_v35, %v2682_v15  ;;  %v248_v15 = vld [vmem:[%s4170_s2 + $0x8] sm:$0xff] }
 0x218   : > { %v2061_v63 = vpop.permute.xlu0 %2060 }
 0x219   : > { %v2109_v46 = vsel %vm434_vm5, %v2108_v30, %v2061_v63 }
 0x21c   : > { %v4055_v2 = vpop.permute.xlu2 %1259 }
 0x21e   : > { %v4053_v26 = vpop.permute.xlu1 %2659 }
 0x21f   : > { %v2661_v33 = vunpack.i.l.bf16 %v4053_v26 }
 0x220   : > { %v2655_v18 = vpop.permute.xlu0 %2654 }
 0x221   : > { %v2656_v41 = vunpack.i.l.bf16 %v2655_v18  ;;  %v2657_v12 = vunpack.i.h.bf16 %v2655_v18  ;;  %v2662_v18 = vunpack.i.h.bf16 %v4053_v26 }
 0x223   : > { %v1486_v8 = vsel %vm434_vm5, %v1485_v51, %v2656_v41  ;;  %v1493_v56 = vsel %vm434_vm5, %v1492_v53, %v2657_v12  ;;  %v1704_v20 = vsel %vm434_vm5, %v4038_v11, %v2662_v18 }
 0x224   : > { %v4059_v4 = vpop.permute.xlu2 %2694 }
 0x225   : > { %v2697_v26 = vunpack.i.h.bf16 %v4059_v4 }
 0x226   : > { %v2093_v6 = vpop.permute.xlu1 %2092 }
 0x227   : > { %v2117_v59 = vsel %vm436_vm6, %v2116_v40, %v2093_v6  ;;  %v1914_v11 = vsel %vm442_vm9, %v1913_v45, %v2697_v26  ;;  %v4223_v40 = vld [vmem:[#allocation2_spill] sm:$0xff] }
 0x228   : > { %v2065_v22 = vpop.permute.xlu0 %2064 }
 0x229   : > { %v2110_v19 = vsel %vm436_vm6, %v2109_v46, %v2065_v22 }
 0x22c   : > { %v4061_v47 = vpop.permute.xlu2 %1263 }
 0x22e   : > { %v4057_v62 = vpop.permute.xlu1 %2674 }
 0x230   : > { %v2670_v43 = vpop.permute.xlu0 %2669 }
 0x231   : > { %v2671_v7 = vunpack.i.l.bf16 %v2670_v43  ;;  %v2672_v54 = vunpack.i.h.bf16 %v2670_v43  ;;  %v1286_v43 = vsel %vm432_vm4, %v1285_v24, %v4047_v13  ;;  %v2677_v13 = vunpack.i.h.bf16 %v4057_v62 }
 0x232   : > { %v1287_v31 = vsel %vm434_vm5, %v1286_v43, %v4055_v2 }
 0x233   : > { %v1487_v3 = vsel %vm436_vm6, %v1486_v8, %v2671_v7  ;;  %v1494_v16 = vsel %vm436_vm6, %v1493_v56, %v2672_v54  ;;  %v1288_v35 = vsel %vm436_vm6, %v1287_v31, %v4061_v47  ;;  %v1705_v47 = vsel %vm436_vm6, %v1704_v20, %v2677_v13 }
 0x234   : > { %v2077_v14 = vpop.permute.xlu2 %2076 }
 0x236   : > { %v2097_v36 = vpop.permute.xlu1 %2096 }
 0x237   : > { %v2118_v10 = vsel %vm438_vm7, %v2117_v59, %v2097_v36  ;;  %v2696_v36 = vunpack.i.l.bf16 %v4059_v4 }
 0x238   : > { %v2069_v5 = vpop.permute.xlu0 %2068 }
 0x239   : > { %v2111_v44 = vsel %vm438_vm7, %v2110_v19, %v2069_v5  ;;  %v1907_v19 = vsel %vm442_vm9, %v1906_v48, %v2696_v36 }
 0x23c   : > { %v2710_v49 = vpop.permute.xlu2 %2709 }
 0x23d   : > { %v2711_v17 = vunpack.i.l.bf16 %v2710_v49  ;;  %v2712_v5 = vunpack.i.h.bf16 %v2710_v49 }
 0x23e   : > { %v4063_v55 = vpop.permute.xlu1 %2689 }
 0x23f   : > { %v2691_v60 = vunpack.i.l.bf16 %v4063_v55  ;;  %v2692_v4 = vunpack.i.h.bf16 %v4063_v55 }
 0x240   : > { %v2685_v23 = vpop.permute.xlu0 %2684 }
 0x241   : > { %v2686_v61 = vunpack.i.l.bf16 %v2685_v23  ;;  %v2687_v0 = vunpack.i.h.bf16 %v2685_v23  ;;  %v2676_v23 = vunpack.i.l.bf16 %v4057_v62  ;;  %v1706_v7 = vsel %vm438_vm7, %v1705_v47, %v2692_v4 }
 0x243   : > { %v1488_v52 = vsel %vm438_vm7, %v1487_v3, %v2686_v61  ;;  %v1495_v57 = vsel %vm438_vm7, %v1494_v16, %v2687_v0  ;;  %v4222_v0 = vld [vmem:[#allocation5_spill] sm:$0xff] }
 0x246   : > { %v2101_v9 = vpop.permute.xlu1 %2100 }
 0x247   : > { %v2119_v53 = vsel %vm440_vm8, %v2118_v10, %v2101_v9 }
 0x248   : > { %v2073_v1 = vpop.permute.xlu0 %2072 }
 0x249   : > { %v2112_v42 = vsel %vm440_vm8, %v2111_v44, %v2073_v1 }
 0x24a   : > { %v2113_v29 = vsel %vm442_vm9, %v2112_v42, %v2077_v14  ;;  %v1697_v14 = vsel %vm434_vm5, %v4041_v58, %v2661_v33  ;;  %v1276_v58 = vpop.permute.xlu2 %1275 }
 0x24b   : > { %2346 = vmatpush.msk.msra.mxu0 %vm2145_vm10, %v2113_v29  ;;  %v1698_v44 = vsel %vm436_vm6, %v1697_v14, %v2676_v23 }
 0x24c   : > { %v1699_v55 = vsel %vm438_vm7, %v1698_v44, %v2691_v60 }
 0x24e   : > { %v4075_v38 = vpop.permute.xlu1 %2704 }
 0x24f   : > { %v2707_v46 = vunpack.i.h.bf16 %v4075_v38  ;;  %v2706_v2 = vunpack.i.l.bf16 %v4075_v38 }
 0x250   : > { %v2700_v21 = vpop.permute.xlu0 %2699 }
 0x251   : > { %v2701_v37 = vunpack.i.l.bf16 %v2700_v21  ;;  %v2702_v39 = vunpack.i.h.bf16 %v2700_v21  ;;  %v1700_v8 = vsel %vm440_vm8, %v1699_v55, %v2706_v2  ;;  %v2141_v21 = vrot.slane %v1907_v19, 4 }
 0x252   : > { %v1707_v3 = vsel %vm440_vm8, %v1706_v7, %v2707_v46 }
 0x253   : > { %v1489_v32 = vsel %vm440_vm8, %v1488_v52, %v2701_v37  ;;  %v1496_v6 = vsel %vm440_vm8, %v1495_v57, %v2702_v39  ;;  %v2142_v37 = vrot.slane %v1914_v11, 4  ;;  %v4224_v39 = vld [vmem:[#allocation3_spill] sm:$0xff] }
 0x254   : > { %v1490_v27 = vsel %vm442_vm9, %v1489_v32, %v2711_v17  ;;  %v1497_v30 = vsel %vm442_vm9, %v1496_v6, %v2712_v5  ;;  %v4221_v32 = vld [vmem:[#allocation4_spill] sm:$0xff] }
 0x255   : > { %v2135_v34 = vrot.slane %v1490_v27, 4  ;;  %v2136_v42 = vrot.slane %v1497_v30, 4  ;;  %v246_v27 = vld [vmem:[%s4169_s1] sm:$0xff] }
 0x256   : > { %v1268_v50 = vpop.permute.xlu1 %1267 }
 0x257   : > { %v2150_v51 = vsel %vm2145_vm10, %v4220_v28, %v2135_v34  ;;  %v1289_v62 = vsel %vm438_vm7, %v1288_v35, %v1268_v50  ;;  %v247_v34 = vld [vmem:[%s4170_s2] sm:$0xff] }
 0x258   : > { %v2105_v63 = vpop.permute.xlu0 %2104 }
 0x259   : > { %v2120_v22 = vsel %vm442_vm9, %v2119_v53, %v2105_v63 }
 0x25a   : > { %2348 = vmatpush.msk.msra.mxu1 %vm2145_vm10, %v2120_v22 }
 0x25e   : > { %v1272_v9 = vpop.permute.xlu1 %1271 }
 0x25f   : > { %v1290_v1 = vsel %vm440_vm8, %v1289_v62, %v1272_v9 }
 0x260   : > { %v2715_v29 = vpop.permute.xlu0 %2714  ;;  %v1291_v41 = vsel %vm442_vm9, %v1290_v1, %v1276_v58 }
 0x261   : > { %v2717_v61 = vunpack.i.h.bf16 %v2715_v29  ;;  %v2716_v38 = vunpack.i.l.bf16 %v2715_v29  ;;  %v2151_v49 = vsel %vm2145_vm10, %v1291_v41, %v2136_v42 }
 0x263   : > { %v1701_v12 = vsel %vm442_vm9, %v1700_v8, %v2716_v38  ;;  %v1708_v17 = vsel %vm442_vm9, %v1707_v3, %v2717_v61 }
 0x264   : > { %v2152_v52 = vsel %vm2145_vm10, %v1701_v12, %v2141_v21  ;;  %v2153_v54 = vsel %vm2145_vm10, %v1708_v17, %v2142_v37 }
 0x265   : > { %2176 = vmatpush.msra.mxu0 %v2152_v52  ;;  %2196 = vmatpush.msra.mxu1 %v2153_v54 }
 0x267   : > { %2177 = vmatpush.msra.mxu0 %v2150_v51  ;;  %2197 = vmatpush.msra.mxu1 %v2151_v49 }
 0x269   : > { %2178 = vmatpush.msra.mxu0 %v4221_v32  ;;  %2198 = vmatpush.msra.mxu1 %v4222_v0 }
 0x26b   : > { %2179 = vmatpush.msra.mxu0 %v4223_v40  ;;  %2199 = vmatpush.msra.mxu1 %v4224_v39 }
 0x26c   : > { %2347 = vmatmul.msk.f32.vlgmr.msra.gmra.mxu0 %vm2154_vm11, %v246_v27  ;;  %2349 = vmatmul.msk.f32.vlgmr.msra.gmra.mxu1 %vm2154_vm11, %v246_v27 }
 0x2e9   : > { %v2181_v56 = vpop.f32.mrf.mxu0  ;;  %v2201_v59 = vpop.f32.mrf.mxu1 }
 0x2ea   : > { %v2182_v50 = vadd.f32 %v2181_v56, %v247_v34  ;;  %v2202_v25 = vadd.f32 %v2201_v59, %v248_v15 }
 0x2ec   : > { %2204 = vst [vmem:[%s237_s17] sm:$0xff] %v2182_v50  ;;  %v2206_v16 = vadd.f32 %v2202_v25, %v2182_v50  ;;  %v2210_v10 = vmul.f32 %v2182_v50, %v2182_v50  ;;  %v2211_v28 = vmul.f32 %v2202_v25, %v2202_v25 }
 0x2ed   : > { %2205 = vst [vmem:[%s237_s17 + $0x8] sm:$0xff] %v2202_v25 }
 0x2ee   : > { %2207 = vadd.xlane.f32.xlu0 %v2206_v16  ;;  %v2212_v51 = vadd.f32 %v2211_v28, %v2210_v10 }
 0x2f0   : > { %2213 = vadd.xlane.f32.xlu1 %v2212_v51 }
 0x361   : > { %v2208_v24 = vpop.xlane.xlu0 %2207 }
 0x362   : > { %2217 = vst.msk [vmem:[%s241_s23] sm:$0xff] %vm2216_vm12, %v2208_v24 }
 0x363   : > { %v2214_v57 = vpop.xlane.xlu1 %2213 }
 0x364   : > { %2218 = vst.msk [vmem:[%s245_s26] sm:$0xff] %vm2216_vm12, %v2214_v57 }
 0x365 PF: > { %s16_s18 = sadd.s32 1, %s2727_s18  }
 0x366   : > { %p13_p4 = scmp.ge.s32.totalorder %s16_s18, 4  }
 0x368   :  { %15 = sbr.rel (!%p13_p4) target bundleno = 1 (0x1), region = 86 }

</bundles_post_ra>
